<compile_context>
chip_gen: v7x
topology: tpu7x:2x2x1
jax: 0.10.0
libtpu: 0.0.40
codegen_flags: <defaults>
</compile_context>

<pallas_src>
import jax
import jax.numpy as jnp
from jax.experimental import pallas as pl
from jax.experimental.pallas import tpu as pltpu

HIDDEN_SIZE = 500
NUM_CLASSES = 10
IN_FEATURES = 28 * 28          # 784

# TPU-aligned padded sizes used inside the kernel (zero padding is exact).
IN_PAD = 896                   # 784 -> 7*128 : lane-dense x tiles
HIDDEN_PAD = 512               # 500 -> 512   : (8,128)-aligned K/N tiles
OUT_PAD = 128                  # 10  -> 128   : lane-dense unmasked stores


def _round_up(n, m):
    return ((n + m - 1) // m) * m


def _default_max_batch_tile():
    """Generation-aware batch tile cap: 512 on v5-and-older, 1024 on v6e/v7x."""
    try:
        kind = jax.devices()[0].device_kind.lower()
    except Exception:
        return 512
    if any(v in kind for v in ("v2", "v3", "v4", "v5")):
        return 512
    return 1024


def _pick_batch_tile(b, max_tile):
    """Rows per grid step: multiple of 8; >=2 steps for medium/large batches
    (keeps both v7x TensorCores busy), single step for small batches."""
    if b <= 8:
        return 8
    if b < 512:
        return _round_up(b, 8)                       # single grid step
    g = max(pl.cdiv(b, max_tile), 2)                 # at least 2 grid steps
    return min(max_tile, _round_up(pl.cdiv(b, g), 256))


def _mlp_kernel(x_ref,
                w1_ref, b1_ref,
                w2_ref, b2_ref,
                w3_ref, b3_ref,
                w4_ref, b4_ref,
                o_ref):
    # x tile: (TB, 896) bf16.  Weights (bf16) are VMEM-resident across grid
    # steps (constant index_map).  Chained MXU matmuls, f32 accumulation;
    # intermediates re-cast to bf16 so every dot stays MXU-native.  Bias adds
    # stay f32; only the final store narrows to bf16.
    h = jnp.dot(x_ref[...], w1_ref[...],
                preferred_element_type=jnp.float32) + b1_ref[...]
    h = jnp.dot(h.astype(jnp.bfloat16), w2_ref[...],
                preferred_element_type=jnp.float32) + b2_ref[...]
    h = jnp.dot(h.astype(jnp.bfloat16), w3_ref[...],
                preferred_element_type=jnp.float32) + b3_ref[...]
    h = jnp.dot(h.astype(jnp.bfloat16), w4_ref[...],
                preferred_element_type=jnp.float32) + b4_ref[...]
    o_ref[...] = h.astype(o_ref.dtype)


def prepare_params(params):
    """Zero-pad params to TPU-aligned shapes (ONCE, at load time).
    Weights -> bf16 (in, out); biases stay f32 (1, out)."""
    (w1, b1), (w2, b2), (w3, b3), (w4, b4) = params

    def pad_w(w, rows, cols):
        out = jnp.zeros((rows, cols), jnp.float32)
        out = out.at[: w.shape[0], : w.shape[1]].set(w)
        return out.astype(jnp.bfloat16)

    def pad_b(bv, cols):
        bv = bv.reshape(1, -1).astype(jnp.float32)
        out = jnp.zeros((1, cols), jnp.float32)
        return out.at[:, : bv.shape[1]].set(bv)

    return (
        pad_w(w1, IN_PAD, HIDDEN_PAD),     pad_b(b1, HIDDEN_PAD),
        pad_w(w2, HIDDEN_PAD, HIDDEN_PAD), pad_b(b2, HIDDEN_PAD),
        pad_w(w3, HIDDEN_PAD, HIDDEN_PAD), pad_b(b3, HIDDEN_PAD),
        pad_w(w4, HIDDEN_PAD, OUT_PAD),    pad_b(b4, OUT_PAD),
    )


def mlp_forward(x, padded_params, *, max_batch_tile=None):
    """x: (b, w, h, c) with w*h*c == 784.  padded_params: from prepare_params().
    Returns (b, NUM_CLASSES) float32."""
    if max_batch_tile is None:
        max_batch_tile = _default_max_batch_tile()

    b = x.shape[0]
    tb = _pick_batch_tile(b, max_batch_tile)
    bp = _round_up(b, tb)

    # One fused pass over x: flatten -> bf16 -> pad batch rows and K columns.
    x2d = x.reshape(-1, IN_FEATURES).astype(jnp.bfloat16)
    x2d = jnp.pad(x2d, ((0, bp - b), (0, IN_PAD - IN_FEATURES)))

    w1p, b1p, w2p, b2p, w3p, b3p, w4p, b4p = padded_params

    def const(shape):
        return pl.BlockSpec(shape, lambda i: (0, 0))

    flops = 2 * bp * (IN_PAD * HIDDEN_PAD
                      + 2 * HIDDEN_PAD * HIDDEN_PAD
                      + HIDDEN_PAD * OUT_PAD)
    bytes_accessed = (x2d.size * x2d.dtype.itemsize
                      + sum(p.size * p.dtype.itemsize for p in padded_params)
                      + bp * OUT_PAD * 2)

    out = pl.pallas_call(
        _mlp_kernel,
        out_shape=jax.ShapeDtypeStruct((bp, OUT_PAD), jnp.bfloat16),
        grid=(bp // tb,),
        in_specs=[
            pl.BlockSpec((tb, IN_PAD), lambda i: (i, 0)),
            const(w1p.shape), const(b1p.shape),
            const(w2p.shape), const(b2p.shape),
            const(w3p.shape), const(b3p.shape),
            const(w4p.shape), const(b4p.shape),
        ],
        out_specs=pl.BlockSpec((tb, OUT_PAD), lambda i: (i, 0)),
        compiler_params=pltpu.CompilerParams(
            dimension_semantics=("parallel",),
            vmem_limit_bytes=32 << 20,
        ),
        cost_estimate=pl.CostEstimate(
            flops=flops, transcendentals=0, bytes_accessed=bytes_accessed),
    )(x2d, w1p, b1p, w2p, b2p, w3p, b3p, w4p, b4p)

    # Strip batch padding + lane-padded columns; return f32 like the module.
    return out[:b, :NUM_CLASSES].astype(jnp.float32)


def init_params(key):
    """Deterministic init mimicking torch.nn.Linear (uniform +-1/sqrt(fan_in)).
    Weights stored transposed: (in_features, out_features); biases (out,)."""
    dims = [(IN_FEATURES, HIDDEN_SIZE),
            (HIDDEN_SIZE, HIDDEN_SIZE),
            (HIDDEN_SIZE, HIDDEN_SIZE),
            (HIDDEN_SIZE, NUM_CLASSES)]
    params = []
    for (fan_in, fan_out) in dims:
        key, kw, kb = jax.random.split(key, 3)
        bound = 1.0 / jnp.sqrt(float(fan_in))
        w = jax.random.uniform(kw, (fan_in, fan_out), jnp.float32, -bound, bound)
        bvec = jax.random.uniform(kb, (fan_out,), jnp.float32, -bound, bound)
        params.append((w, bvec))
    return params


def reference_forward(x, params, dtype=jnp.float32):
    """Plain-JAX reference.  dtype selects the matmul input precision
    (bf16 mirrors the kernel's casts; accumulation is always f32)."""
    h = x.reshape(-1, IN_FEATURES)
    for (w, bvec) in params:
        h = (jnp.dot(h.astype(dtype), w.astype(dtype),
                     preferred_element_type=jnp.float32)
             + bvec.reshape(1, -1))
    return h


if __name__ == "__main__":
    key = jax.random.PRNGKey(0)
    key, kx = jax.random.split(key)
    # (b, w, h, c) as the PyTorch forward expects; 28*28*1 == 784
    x = jax.random.normal(kx, (2, 28, 28, 1), jnp.float32)

    params = init_params(key)
    padded = prepare_params(params)          # hoisted: once per param load

    out = jax.block_until_ready(mlp_forward(x, padded))
    assert out.shape == (2, NUM_CLASSES), out.shape

    # Strict check vs. a bf16-matmul / f32-accumulate reference (same numerics
    # as the kernel, modulo the final bf16 store), plus a looser sanity check
    # vs. the pure-f32 reference (intentional bf16 precision trade-off).
    ref_bf16 = reference_forward(x, params, jnp.bfloat16)
    ref_f32 = reference_forward(x, params, jnp.float32)
    assert jnp.allclose(out, ref_bf16, atol=2e-2, rtol=2e-2), "mismatch vs bf16 reference"
    assert jnp.allclose(out, ref_f32, atol=5e-2, rtol=5e-2), "mismatch vs f32 reference"

    print("KERNEL_OK")
</pallas_src>

<mosaic_0001>
module attributes {stable_mosaic.version = 11 : i64} {
  func.func @_mlp_kernel(%arg0: i32, %arg1: memref<8x896xbf16, #tpu.memory_space<vmem>>, %arg2: memref<896x512xbf16, #tpu.memory_space<vmem>>, %arg3: memref<1x512xf32, #tpu.memory_space<vmem>>, %arg4: memref<512x512xbf16, #tpu.memory_space<vmem>>, %arg5: memref<1x512xf32, #tpu.memory_space<vmem>>, %arg6: memref<512x512xbf16, #tpu.memory_space<vmem>>, %arg7: memref<1x512xf32, #tpu.memory_space<vmem>>, %arg8: memref<512x128xbf16, #tpu.memory_space<vmem>>, %arg9: memref<1x128xf32, #tpu.memory_space<vmem>>, %arg10: memref<8x128xbf16, #tpu.memory_space<vmem>>) attributes {dimension_semantics = [#tpu.dimension_semantics<parallel>], iteration_bounds = array<i64: 1>, scalar_prefetch = 0 : i64, scratch_operands = 0 : i64, tpu.core_type = #tpu.core_type<tc>, window_params = [{transform_indices = @transform_0, window_bounds = array<i64: 8, 896>}, {pipeline_mode = #tpu.pipeline_mode<synchronous>, transform_indices = @transform_1, window_bounds = array<i64: 896, 512>}, {pipeline_mode = #tpu.pipeline_mode<synchronous>, transform_indices = @transform_2, window_bounds = array<i64: 1, 512>}, {pipeline_mode = #tpu.pipeline_mode<synchronous>, transform_indices = @transform_3, window_bounds = array<i64: 512, 512>}, {pipeline_mode = #tpu.pipeline_mode<synchronous>, transform_indices = @transform_4, window_bounds = array<i64: 1, 512>}, {pipeline_mode = #tpu.pipeline_mode<synchronous>, transform_indices = @transform_5, window_bounds = array<i64: 512, 512>}, {pipeline_mode = #tpu.pipeline_mode<synchronous>, transform_indices = @transform_6, window_bounds = array<i64: 1, 512>}, {pipeline_mode = #tpu.pipeline_mode<synchronous>, transform_indices = @transform_7, window_bounds = array<i64: 512, 128>}, {pipeline_mode = #tpu.pipeline_mode<synchronous>, transform_indices = @transform_8, window_bounds = array<i64: 1, 128>}, {transform_indices = @transform_9, window_bounds = array<i64: 8, 128>}]} {
    %c0 = arith.constant 0 : index
    %c0_0 = arith.constant 0 : index
    %0 = vector.load %arg1[%c0, %c0_0] : memref<8x896xbf16, #tpu.memory_space<vmem>>, vector<8x896xbf16>
    %c0_1 = arith.constant 0 : index
    %c0_2 = arith.constant 0 : index
    %1 = vector.load %arg2[%c0_1, %c0_2] : memref<896x512xbf16, #tpu.memory_space<vmem>>, vector<896x512xbf16>
    %cst = arith.constant dense<0.000000e+00> : vector<8x512xf32>
    %2 = tpu.matmul %0, %1, %cst {dimension_numbers = #tpu.dot_dimension_numbers<[1], [0], [0], [1], [0, 0, 1, 1], [], []>} : vector<8x896xbf16>, vector<896x512xbf16>, vector<8x512xf32> -> vector<8x512xf32>
    %c0_3 = arith.constant 0 : index
    %c0_4 = arith.constant 0 : index
    %3 = vector.load %arg3[%c0_3, %c0_4] : memref<1x512xf32, #tpu.memory_space<vmem>>, vector<1x512xf32>
    %4 = vector.broadcast %3 : vector<1x512xf32> to vector<8x512xf32>
    %5 = arith.addf %2, %4 : vector<8x512xf32>
    %6 = arith.truncf %5 : vector<8x512xf32> to vector<8x512xbf16>
    %c0_5 = arith.constant 0 : index
    %c0_6 = arith.constant 0 : index
    %7 = vector.load %arg4[%c0_5, %c0_6] : memref<512x512xbf16, #tpu.memory_space<vmem>>, vector<512x512xbf16>
    %cst_7 = arith.constant dense<0.000000e+00> : vector<8x512xf32>
    %8 = tpu.matmul %6, %7, %cst_7 {dimension_numbers = #tpu.dot_dimension_numbers<[1], [0], [0], [1], [0, 0, 1, 1], [], []>} : vector<8x512xbf16>, vector<512x512xbf16>, vector<8x512xf32> -> vector<8x512xf32>
    %c0_8 = arith.constant 0 : index
    %c0_9 = arith.constant 0 : index
    %9 = vector.load %arg5[%c0_8, %c0_9] : memref<1x512xf32, #tpu.memory_space<vmem>>, vector<1x512xf32>
    %10 = vector.broadcast %9 : vector<1x512xf32> to vector<8x512xf32>
    %11 = arith.addf %8, %10 : vector<8x512xf32>
    %12 = arith.truncf %11 : vector<8x512xf32> to vector<8x512xbf16>
    %c0_10 = arith.constant 0 : index
    %c0_11 = arith.constant 0 : index
    %13 = vector.load %arg6[%c0_10, %c0_11] : memref<512x512xbf16, #tpu.memory_space<vmem>>, vector<512x512xbf16>
    %cst_12 = arith.constant dense<0.000000e+00> : vector<8x512xf32>
    %14 = tpu.matmul %12, %13, %cst_12 {dimension_numbers = #tpu.dot_dimension_numbers<[1], [0], [0], [1], [0, 0, 1, 1], [], []>} : vector<8x512xbf16>, vector<512x512xbf16>, vector<8x512xf32> -> vector<8x512xf32>
    %c0_13 = arith.constant 0 : index
    %c0_14 = arith.constant 0 : index
    %15 = vector.load %arg7[%c0_13, %c0_14] : memref<1x512xf32, #tpu.memory_space<vmem>>, vector<1x512xf32>
    %16 = vector.broadcast %15 : vector<1x512xf32> to vector<8x512xf32>
    %17 = arith.addf %14, %16 : vector<8x512xf32>
    %18 = arith.truncf %17 : vector<8x512xf32> to vector<8x512xbf16>
    %c0_15 = arith.constant 0 : index
    %c0_16 = arith.constant 0 : index
    %19 = vector.load %arg8[%c0_15, %c0_16] : memref<512x128xbf16, #tpu.memory_space<vmem>>, vector<512x128xbf16>
    %cst_17 = arith.constant dense<0.000000e+00> : vector<8x128xf32>
    %20 = tpu.matmul %18, %19, %cst_17 {dimension_numbers = #tpu.dot_dimension_numbers<[1], [0], [0], [1], [0, 0, 1, 1], [], []>} : vector<8x512xbf16>, vector<512x128xbf16>, vector<8x128xf32> -> vector<8x128xf32>
    %c0_18 = arith.constant 0 : index
    %c0_19 = arith.constant 0 : index
    %21 = vector.load %arg9[%c0_18, %c0_19] : memref<1x128xf32, #tpu.memory_space<vmem>>, vector<1x128xf32>
    %22 = vector.broadcast %21 : vector<1x128xf32> to vector<8x128xf32>
    %23 = arith.addf %20, %22 : vector<8x128xf32>
    %24 = arith.truncf %23 : vector<8x128xf32> to vector<8x128xbf16>
    %c0_20 = arith.constant 0 : index
    %c0_21 = arith.constant 0 : index
    %25 = vector.load %arg10[%c0_20, %c0_21] : memref<8x128xbf16, #tpu.memory_space<vmem>>, vector<8x128xbf16>
    tpu.vector_store %arg10[%c0_20, %c0_21], %24 {strides = array<i32>} : memref<8x128xbf16, #tpu.memory_space<vmem>>, vector<8x128xbf16>,
    return
  }
  func.func @transform_0(%arg0: i32) -> (i32, i32) {
    %c0_i32 = arith.constant 0 : i32
    %c0_i32_0 = arith.constant 0 : i32
    return %arg0, %c0_i32 : i32, i32
  }
  func.func @transform_1(%arg0: i32) -> (i32, i32) {
    %c0_i32 = arith.constant 0 : i32
    %c0_i32_0 = arith.constant 0 : i32
    %c0_i32_1 = arith.constant 0 : i32
    return %c0_i32, %c0_i32_0 : i32, i32
  }
  func.func @transform_2(%arg0: i32) -> (i32, i32) {
    %c0_i32 = arith.constant 0 : i32
    %c0_i32_0 = arith.constant 0 : i32
    %c0_i32_1 = arith.constant 0 : i32
    return %c0_i32, %c0_i32_0 : i32, i32
  }
  func.func @transform_3(%arg0: i32) -> (i32, i32) {
    %c0_i32 = arith.constant 0 : i32
    %c0_i32_0 = arith.constant 0 : i32
    %c0_i32_1 = arith.constant 0 : i32
    return %c0_i32, %c0_i32_0 : i32, i32
  }
  func.func @transform_4(%arg0: i32) -> (i32, i32) {
    %c0_i32 = arith.constant 0 : i32
    %c0_i32_0 = arith.constant 0 : i32
    %c0_i32_1 = arith.constant 0 : i32
    return %c0_i32, %c0_i32_0 : i32, i32
  }
  func.func @transform_5(%arg0: i32) -> (i32, i32) {
    %c0_i32 = arith.constant 0 : i32
    %c0_i32_0 = arith.constant 0 : i32
    %c0_i32_1 = arith.constant 0 : i32
    return %c0_i32, %c0_i32_0 : i32, i32
  }
  func.func @transform_6(%arg0: i32) -> (i32, i32) {
    %c0_i32 = arith.constant 0 : i32
    %c0_i32_0 = arith.constant 0 : i32
    %c0_i32_1 = arith.constant 0 : i32
    return %c0_i32, %c0_i32_0 : i32, i32
  }
  func.func @transform_7(%arg0: i32) -> (i32, i32) {
    %c0_i32 = arith.constant 0 : i32
    %c0_i32_0 = arith.constant 0 : i32
    %c0_i32_1 = arith.constant 0 : i32
    return %c0_i32, %c0_i32_0 : i32, i32
  }
  func.func @transform_8(%arg0: i32) -> (i32, i32) {
    %c0_i32 = arith.constant 0 : i32
    %c0_i32_0 = arith.constant 0 : i32
    %c0_i32_1 = arith.constant 0 : i32
    return %c0_i32, %c0_i32_0 : i32, i32
  }
  func.func @transform_9(%arg0: i32) -> (i32, i32) {
    %c0_i32 = arith.constant 0 : i32
    %c0_i32_0 = arith.constant 0 : i32
    return %arg0, %c0_i32 : i32, i32
  }
}

</mosaic_0001>

<bundles_post_ra>
// kernel: tpu_custom_call.1
= control target key start
LH: loop header
LB: loop body
LE: loop exit
PB: predicated region body
PF: predicated region fallthrough
CT: control target
= control target key end

     0   :  { %14 = vsyncpa [#allocation3], 0  ;;  %s5841_s0 = inlined_call_operand.hbm [shape: bf16[8,896], index: 0, kind: input, shape index: {}]   ;;  %s5842_s1 = inlined_call_operand.hbm [shape: bf16[896,512], index: 1, kind: input, shape index: {}]   ;;  %s5843_s2 = inlined_call_operand.vmem [shape: f32[1,512], index: 2, kind: input, shape index: {}]   ;;  %s5844_s3 = inlined_call_operand.hbm [shape: bf16[512,512], index: 3, kind: input, shape index: {}]   ;;  %s5845_s4 = inlined_call_operand.vmem [shape: f32[1,512], index: 4, kind: input, shape index: {}]   ;;  %s5846_s5 = inlined_call_operand.hbm [shape: bf16[512,512], index: 5, kind: input, shape index: {}]   ;;  %s5847_s6 = inlined_call_operand.vmem [shape: f32[1,512], index: 6, kind: input, shape index: {}]   ;;  %s5848_s7 = inlined_call_operand.hbm [shape: bf16[512,128], index: 7, kind: input, shape index: {}]   ;;  %s5849_s8 = inlined_call_operand.vmem [shape: f32[1,128], index: 8, kind: input, shape index: {}]   ;;  %s5850_s9 = inlined_call_operand.hbm [shape: bf16[8,128], index: 9, kind: output, shape index: {}]  }
   0x1   :  { %15 = vsyncpa [#allocation6], 0 }
   0x2   :  { %16 = vsyncpa [#allocation9], 0 }
   0x3   :  { %17 = vsyncpa [#allocation4], 0  ;;  %s5631_s30 = smov [#allocation5]   ;;  %s5491_s13 = scalar_lea.hbm %s5842_s1, 28672 }
   0x4   :  { %s33_s10 = sshll.u32 %s5631_s30, 4  ;;  %p5492_p0 = scmp.ne.s32.totalorder %s5842_s1, %s5491_s13  ;;  %s34_s10 = int_to_ptr.vmem [resolvable:$true] %s33_s10 }
   0x5   :  { %p5495_p1 = scmp.lt.u32.totalorder %s5491_s13, %s5842_s1 }
   0x7   :  { %p5497_p2 = pnand %p5495_p1, %p5492_p0 }
   0x9   :  { %5500 = shalt.err (!%p5497_p2)
}
   0xa   :  { %s5501_s18 = scalar_lea.vmem %s34_s10, 28672  ;;  %p5506_p4 = scmp.lt.s32.totalorder %s34_s10, %s34_s10 }
   0xb   :  { %p5502_p3 = scmp.ne.s32.totalorder %s34_s10, %s5501_s18  ;;  %p5507_p5 = scmp.lt.s32.totalorder %s5501_s18, %s5501_s18 }
   0xd   :  { %p5508_p6 = por %p5507_p5, %p5506_p4 }
   0xf   :  { %p5509_p7 = pnand %p5508_p6, %p5502_p3 }
  0x11   :  { %5512 = shalt.err (!%p5509_p7)
}
  0x12   :  { %s5632_s19 = smov 256   ;;  %s5633_s20 = smov 16  }
  0x13   :  { %39 = dma.hbm_to_vmem [thread:$0]  %s5842_s1, 28672, %s34_s10, [#allocation6], %s5632_s19, %s5632_s19, %s5633_s20  }
  0x14   :  { %s5634_s23 = smov [#allocation8]   ;;  %s5635_s25 = smov [#allocation2]  }
  0x15   :  { %s61_s24 = sshll.u32 %s5634_s23, 4  ;;  %s24_s26 = sshll.u32 %s5635_s25, 4  ;;  %s62_s24 = int_to_ptr.vmem [resolvable:$true] %s61_s24  ;;  %s25_s26 = int_to_ptr.vmem [resolvable:$true] %s24_s26 }
  0x16   :  { %s5513_s29 = scalar_lea.hbm %s5846_s5, 16384 }
  0x17   :  { %p5514_p8 = scmp.ne.s32.totalorder %s5846_s5, %s5513_s29  ;;  %p5517_p9 = scmp.lt.u32.totalorder %s5513_s29, %s5846_s5 }
  0x19   :  { %p5519_p10 = pnand %p5517_p9, %p5514_p8 }
  0x1b   :  { %5522 = shalt.err (!%p5519_p10)
}
  0x1c   :  { %s5523_s1 = scalar_lea.vmem %s62_s24, 16384  ;;  %p5528_p12 = scmp.lt.s32.totalorder %s62_s24, %s62_s24 }
  0x1d   :  { %p5524_p11 = scmp.ne.s32.totalorder %s62_s24, %s5523_s1  ;;  %p5529_p13 = scmp.lt.s32.totalorder %s5523_s1, %s5523_s1 }
  0x1f   :  { %p5530_p0 = por %p5529_p13, %p5528_p12 }
  0x21   :  { %p5531_p1 = pnand %p5530_p0, %p5524_p11 }
  0x23   :  { %5534 = shalt.err (!%p5531_p1)
}
  0x24   :  { %67 = dma.hbm_to_vmem [thread:$0]  %s5846_s5, 16384, %s62_s24, [#allocation9], %s5632_s19, %s5632_s19, %s5633_s20  }
  0x25   :  { %s5535_s17 = scalar_lea.hbm %s5841_s0, 448 }
  0x26   :  { %p5536_p2 = scmp.ne.s32.totalorder %s5841_s0, %s5535_s17  ;;  %p5539_p3 = scmp.lt.u32.totalorder %s5535_s17, %s5841_s0 }
  0x28   :  { %p5541_p4 = pnand %p5539_p3, %p5536_p2 }
  0x2a   :  { %5544 = shalt.err (!%p5541_p4)
}
  0x2b   :  { %s5545_s25 = scalar_lea.vmem %s25_s26, 448  ;;  %p5550_p6 = scmp.lt.s32.totalorder %s25_s26, %s25_s26 }
  0x2c   :  { %p5546_p5 = scmp.ne.s32.totalorder %s25_s26, %s5545_s25  ;;  %p5551_p7 = scmp.lt.s32.totalorder %s5545_s25, %s5545_s25 }
  0x2e   :  { %p5552_p8 = por %p5551_p7, %p5550_p6 }
  0x30   :  { %p5553_p9 = pnand %p5552_p8, %p5546_p5 }
  0x32   :  { %5556 = shalt.err (!%p5553_p9)
}
  0x33   :  { %27 = dma.hbm_to_vmem [thread:$0]  %s5841_s0, 448, %s25_s26, [#allocation3]  }
  0x34   :  { %s5636_s27 = smov [#allocation7]   ;;  %s5637_s29 = smov [#allocation10]  }
  0x35   :  { %s47_s28 = sshll.u32 %s5636_s27, 4  ;;  %s75_s30 = sshll.u32 %s5637_s29, 4  ;;  %s48_s28 = int_to_ptr.vmem [resolvable:$true] %s47_s28  ;;  %s76_s30 = int_to_ptr.vmem [resolvable:$true] %s75_s30 }
  0x36   :  { %s5557_s13 = scalar_lea.hbm %s5844_s3, 16384 }
  0x37   :  { %p5558_p10 = scmp.ne.s32.totalorder %s5844_s3, %s5557_s13  ;;  %p5561_p11 = scmp.lt.u32.totalorder %s5557_s13, %s5844_s3 }
  0x39   :  { %p5563_p12 = pnand %p5561_p11, %p5558_p10 }
  0x3b   :  { %5566 = shalt.err (!%p5563_p12)
}
  0x3c   :  { %s5567_s0 = scalar_lea.vmem %s48_s28, 16384  ;;  %p5572_p0 = scmp.lt.s32.totalorder %s48_s28, %s48_s28 }
  0x3d   :  { %p5568_p13 = scmp.ne.s32.totalorder %s48_s28, %s5567_s0  ;;  %p5573_p1 = scmp.lt.s32.totalorder %s5567_s0, %s5567_s0 }
  0x3f   :  { %p5574_p2 = por %p5573_p1, %p5572_p0 }
  0x41   :  { %p5575_p3 = pnand %p5574_p2, %p5568_p13 }
  0x43   :  { %5578 = shalt.err (!%p5575_p3)
}
  0x44   :  { %53 = dma.hbm_to_vmem [thread:$0]  %s5844_s3, 16384, %s48_s28, [#allocation6], %s5632_s19, %s5632_s19, %s5633_s20  }
  0x45   :  { %s5579_s21 = scalar_lea.hbm %s5848_s7, 4096 }
  0x46   :  { %p5580_p4 = scmp.ne.s32.totalorder %s5848_s7, %s5579_s21  ;;  %p5583_p5 = scmp.lt.u32.totalorder %s5579_s21, %s5848_s7 }
  0x48   :  { %p5585_p6 = pnand %p5583_p5, %p5580_p4 }
  0x4a   :  { %5588 = shalt.err (!%p5585_p6)
}
  0x4b   :  { %s5589_s24 = scalar_lea.vmem %s76_s30, 4096  ;;  %p5594_p8 = scmp.lt.s32.totalorder %s76_s30, %s76_s30 }
  0x4c   :  { %p5590_p7 = scmp.ne.s32.totalorder %s76_s30, %s5589_s24  ;;  %p5595_p9 = scmp.lt.s32.totalorder %s5589_s24, %s5589_s24 }
  0x4e   :  { %p5596_p10 = por %p5595_p9, %p5594_p8 }
  0x50   :  { %p5597_p11 = pnand %p5596_p10, %p5590_p7 }
  0x52   :  { %5600 = shalt.err (!%p5597_p11)
}
  0x53   :  { %s5638_s3 = smov 64   ;;  %s5639_s19 = smov 4  }
  0x54   :  { %81 = dma.hbm_to_vmem [thread:$0]  %s5848_s7, 4096, %s76_s30, [#allocation9], %s5638_s3, %s5638_s3, %s5639_s19  }
  0x55   :  { %5623 = dma.done.wait [#allocation3], 448  }
  0x56   :  { %5624 = vsyncadd [#allocation3], 4294966848 }
  0x57   :  { %5625 = dma.done.wait [#allocation6], 45056  }
  0x58   :  { %5626 = vsyncadd [#allocation6], 4294922240 }
  0x59   :  { %5627 = dma.done.wait [#allocation9], 20480  }
  0x5a   :  { %5628 = vsyncadd [#allocation9], 4294946816  ;;  %v4732_v0 = vld [vmem:[#allocation5 + $0x4] ss:$16 sps:$4 sm:$0xff]   ;;  %v4734_v1 = vld [vmem:[#allocation5 + $0xc] ss:$16 sps:$4 sm:$0xff]  }
  0x5b   :  { %1495 = vmatprep.subr.bf16.mxu0 %v4732_v0  ;;  %v4736_v2 = vld [vmem:[#allocation5] ss:$16 sps:$4 sm:$0xff]   ;;  %v4737_v3 = vld [vmem:[#allocation5 + $0x8] ss:$16 sps:$4 sm:$0xff]   ;;  %1659 = vmatprep.subr.bf16.mxu1 %v4734_v1  ;;  %v4738_v4 = vld [vmem:[#allocation5 + $0x24] ss:$16 sps:$4 sm:$0xff]  }
  0x5c   :  { %1496 = vmatpush1.bf16.msra.mxu0 %v4736_v2  ;;  %1660 = vmatpush1.bf16.msra.mxu1 %v4737_v3  ;;  %v4740_v5 = vld [vmem:[#allocation5 + $0x2c] ss:$16 sps:$4 sm:$0xff]   ;;  %v4742_v6 = vld [vmem:[#allocation5 + $0x20] ss:$16 sps:$4 sm:$0xff]   ;;  %v4743_v7 = vld [vmem:[#allocation5 + $0x28] ss:$16 sps:$4 sm:$0xff]  }
  0x5d   :  { %1497 = vmatprep.subr.bf16.mxu0 %v4738_v4  ;;  %1661 = vmatprep.subr.bf16.mxu1 %v4740_v5  ;;  %v4744_v8 = vld [vmem:[#allocation5 + $0x44] ss:$16 sps:$4 sm:$0xff]   ;;  %v4746_v9 = vld [vmem:[#allocation5 + $0x4c] ss:$16 sps:$4 sm:$0xff]   ;;  %v4748_v10 = vld [vmem:[#allocation5 + $0x40] ss:$16 sps:$4 sm:$0xff]  }
  0x5e   :  { %v4749_v11 = vld [vmem:[#allocation5 + $0x48] ss:$16 sps:$4 sm:$0xff]   ;;  %v4750_v12 = vld [vmem:[#allocation5 + $0x64] ss:$16 sps:$4 sm:$0xff]   ;;  %v4752_v13 = vld [vmem:[#allocation5 + $0x6c] ss:$16 sps:$4 sm:$0xff]  }
  0x5f   :  { %v4754_v14 = vld [vmem:[#allocation5 + $0x60] ss:$16 sps:$4 sm:$0xff]   ;;  %v4755_v15 = vld [vmem:[#allocation5 + $0x68] ss:$16 sps:$4 sm:$0xff]   ;;  %v4756_v16 = vld [vmem:[#allocation5 + $0x84] ss:$16 sps:$4 sm:$0xff]  }
  0x60   :  { %1498 = vmatpush1.bf16.msra.mxu0 %v4742_v6  ;;  %1662 = vmatpush1.bf16.msra.mxu1 %v4743_v7  ;;  %v4758_v17 = vld [vmem:[#allocation5 + $0x8c] ss:$16 sps:$4 sm:$0xff]   ;;  %v4760_v18 = vld [vmem:[#allocation5 + $0x80] ss:$16 sps:$4 sm:$0xff]   ;;  %v4761_v19 = vld [vmem:[#allocation5 + $0x88] ss:$16 sps:$4 sm:$0xff]  }
  0x61   :  { %1499 = vmatprep.subr.bf16.mxu0 %v4744_v8  ;;  %1663 = vmatprep.subr.bf16.mxu1 %v4746_v9  ;;  %v4762_v20 = vld [vmem:[#allocation5 + $0xa4] ss:$16 sps:$4 sm:$0xff]   ;;  %v4764_v21 = vld [vmem:[#allocation5 + $0xac] ss:$16 sps:$4 sm:$0xff]   ;;  %v4766_v22 = vld [vmem:[#allocation5 + $0xa0] ss:$16 sps:$4 sm:$0xff]  }
  0x62   :  { %v4767_v23 = vld [vmem:[#allocation5 + $0xa8] ss:$16 sps:$4 sm:$0xff]   ;;  %v4768_v24 = vld [vmem:[#allocation5 + $0xc4] ss:$16 sps:$4 sm:$0xff]   ;;  %v4770_v25 = vld [vmem:[#allocation5 + $0xcc] ss:$16 sps:$4 sm:$0xff]  }
  0x63   :  { %v4772_v26 = vld [vmem:[#allocation5 + $0xc0] ss:$16 sps:$4 sm:$0xff]   ;;  %v4773_v27 = vld [vmem:[#allocation5 + $0xc8] ss:$16 sps:$4 sm:$0xff]   ;;  %v4774_v28 = vld [vmem:[#allocation5 + $0xe4] ss:$16 sps:$4 sm:$0xff]  }
  0x64   :  { %1500 = vmatpush1.bf16.msra.mxu0 %v4748_v10  ;;  %1664 = vmatpush1.bf16.msra.mxu1 %v4749_v11  ;;  %v4776_v29 = vld [vmem:[#allocation5 + $0xec] ss:$16 sps:$4 sm:$0xff]   ;;  %v4778_v30 = vld [vmem:[#allocation5 + $0xe0] ss:$16 sps:$4 sm:$0xff]   ;;  %v4779_v31 = vld [vmem:[#allocation5 + $0xe8] ss:$16 sps:$4 sm:$0xff]  }
  0x65   :  { %1501 = vmatprep.subr.bf16.mxu0 %v4750_v12  ;;  %1665 = vmatprep.subr.bf16.mxu1 %v4752_v13  ;;  %v4780_v32 = vld [vmem:[#allocation5 + $0x104] ss:$16 sps:$4 sm:$0xff]   ;;  %v4782_v33 = vld [vmem:[#allocation5 + $0x10c] ss:$16 sps:$4 sm:$0xff]   ;;  %v4784_v34 = vld [vmem:[#allocation5 + $0x100] ss:$16 sps:$4 sm:$0xff]  }
  0x66   :  { %v4785_v35 = vld [vmem:[#allocation5 + $0x108] ss:$16 sps:$4 sm:$0xff]   ;;  %v4786_v36 = vld [vmem:[#allocation5 + $0x124] ss:$16 sps:$4 sm:$0xff]   ;;  %v4788_v37 = vld [vmem:[#allocation5 + $0x12c] ss:$16 sps:$4 sm:$0xff]  }
  0x67   :  { %v4790_v38 = vld [vmem:[#allocation5 + $0x120] ss:$16 sps:$4 sm:$0xff]   ;;  %v4791_v39 = vld [vmem:[#allocation5 + $0x128] ss:$16 sps:$4 sm:$0xff]   ;;  %v4792_v40 = vld [vmem:[#allocation5 + $0x144] ss:$16 sps:$4 sm:$0xff]  }
  0x68   :  { %1502 = vmatpush1.bf16.msra.mxu0 %v4754_v14  ;;  %1666 = vmatpush1.bf16.msra.mxu1 %v4755_v15  ;;  %v4794_v41 = vld [vmem:[#allocation5 + $0x14c] ss:$16 sps:$4 sm:$0xff]   ;;  %v4796_v42 = vld [vmem:[#allocation5 + $0x140] ss:$16 sps:$4 sm:$0xff]   ;;  %v4797_v43 = vld [vmem:[#allocation5 + $0x148] ss:$16 sps:$4 sm:$0xff]  }
  0x69   :  { %1503 = vmatprep.subr.bf16.mxu0 %v4756_v16  ;;  %1667 = vmatprep.subr.bf16.mxu1 %v4758_v17  ;;  %v4798_v44 = vld [vmem:[#allocation5 + $0x164] ss:$16 sps:$4 sm:$0xff]   ;;  %v4800_v45 = vld [vmem:[#allocation5 + $0x16c] ss:$16 sps:$4 sm:$0xff]   ;;  %v4802_v47 = vld [vmem:[#allocation5 + $0x160] ss:$16 sps:$4 sm:$0xff]  }
  0x6a   :  { %v100_v46 = vld [vmem:[#allocation2] sm:$0xff]  ;;  %v4806_v51 = vld [vmem:[#allocation5 + $0x18c] ss:$16 sps:$4 sm:$0xff]   ;;  %v4808_v52 = vld [vmem:[#allocation5 + $0x180] ss:$16 sps:$4 sm:$0xff]   ;;  %s5641_s12 = smov [#allocation11]  }
  0x6b   :  { %v4106_v48 = vcombine.high %v100_v46, %v100_v46  ;;  %v4803_v49 = vld [vmem:[#allocation5 + $0x168] ss:$16 sps:$4 sm:$0xff]   ;;  %v4804_v50 = vld [vmem:[#allocation5 + $0x184] ss:$16 sps:$4 sm:$0xff]   ;;  %v4812_v55 = vld [vmem:[#allocation5 + $0x1ac] ss:$16 sps:$4 sm:$0xff]   ;;  %v4105_v4 = vcombine.low %v100_v46, %v100_v46 }
  0x6c   :  { %1504 = vmatpush1.bf16.msra.mxu0 %v4760_v18  ;;  %1668 = vmatpush1.bf16.msra.mxu1 %v4761_v19  ;;  %v4809_v53 = vld [vmem:[#allocation5 + $0x188] ss:$16 sps:$4 sm:$0xff]   ;;  %v4810_v54 = vld [vmem:[#allocation5 + $0x1a4] ss:$16 sps:$4 sm:$0xff]   ;;  %v4814_v56 = vld [vmem:[#allocation5 + $0x1a0] ss:$16 sps:$4 sm:$0xff]  }
  0x6d   :  { %1505 = vmatprep.subr.bf16.mxu0 %v4762_v20  ;;  %1669 = vmatprep.subr.bf16.mxu1 %v4764_v21  ;;  %v4815_v57 = vld [vmem:[#allocation5 + $0x1a8] ss:$16 sps:$4 sm:$0xff]   ;;  %v4816_v58 = vld [vmem:[#allocation5 + $0x1c4] ss:$16 sps:$4 sm:$0xff]   ;;  %v4818_v59 = vld [vmem:[#allocation5 + $0x1cc] ss:$16 sps:$4 sm:$0xff]  }
  0x6e   :  { %1527 = vmatprep.mubr.bf16.mxu0 %v4106_v48  ;;  %1691 = vmatprep.mubr.bf16.mxu1 %v4106_v48  ;;  %v4820_v60 = vld [vmem:[#allocation5 + $0x1c0] ss:$16 sps:$4 sm:$0xff]   ;;  %v4821_v61 = vld [vmem:[#allocation5 + $0x1c8] ss:$16 sps:$4 sm:$0xff]   ;;  %v4822_v62 = vld [vmem:[#allocation5 + $0x1e4] ss:$16 sps:$4 sm:$0xff]  }
  0x6f   :  { %v4824_v63 = vld [vmem:[#allocation5 + $0x1ec] ss:$16 sps:$4 sm:$0xff]   ;;  %v4826_v0 = vld [vmem:[#allocation5 + $0x1e0] ss:$16 sps:$4 sm:$0xff]   ;;  %v4827_v1 = vld [vmem:[#allocation5 + $0x1e8] ss:$16 sps:$4 sm:$0xff]  }
  0x70   :  { %1506 = vmatpush1.bf16.msra.mxu0 %v4766_v22  ;;  %1670 = vmatpush1.bf16.msra.mxu1 %v4767_v23  ;;  %v4832_v2 = vld [vmem:[#allocation5 + $0x204] ss:$16 sps:$4 sm:$0xff]   ;;  %v4835_v3 = vld [vmem:[#allocation5 + $0x20c] ss:$16 sps:$4 sm:$0xff]   ;;  %v4830_v5 = vld [vmem:[#allocation5 + $0x200] ss:$16 sps:$4 sm:$0xff]  }
  0x71   :  { %1507 = vmatprep.subr.bf16.mxu0 %v4768_v24  ;;  %1671 = vmatprep.subr.bf16.mxu1 %v4770_v25  ;;  %v4833_v6 = vld [vmem:[#allocation5 + $0x208] ss:$16 sps:$4 sm:$0xff]   ;;  %v4838_v7 = vld [vmem:[#allocation5 + $0x224] ss:$16 sps:$4 sm:$0xff]   ;;  %v4841_v8 = vld [vmem:[#allocation5 + $0x22c] ss:$16 sps:$4 sm:$0xff]  }
  0x72   :  { %v4836_v9 = vld [vmem:[#allocation5 + $0x220] ss:$16 sps:$4 sm:$0xff]   ;;  %v4839_v10 = vld [vmem:[#allocation5 + $0x228] ss:$16 sps:$4 sm:$0xff]   ;;  %v4844_v11 = vld [vmem:[#allocation5 + $0x244] ss:$16 sps:$4 sm:$0xff]  }
  0x73   :  { %v4847_v12 = vld [vmem:[#allocation5 + $0x24c] ss:$16 sps:$4 sm:$0xff]   ;;  %v4842_v13 = vld [vmem:[#allocation5 + $0x240] ss:$16 sps:$4 sm:$0xff]   ;;  %v4845_v14 = vld [vmem:[#allocation5 + $0x248] ss:$16 sps:$4 sm:$0xff]  }
  0x74   :  { %1508 = vmatpush1.bf16.msra.mxu0 %v4772_v26  ;;  %1672 = vmatpush1.bf16.msra.mxu1 %v4773_v27  ;;  %v4850_v15 = vld [vmem:[#allocation5 + $0x264] ss:$16 sps:$4 sm:$0xff]   ;;  %v4853_v16 = vld [vmem:[#allocation5 + $0x26c] ss:$16 sps:$4 sm:$0xff]   ;;  %v4848_v17 = vld [vmem:[#allocation5 + $0x260] ss:$16 sps:$4 sm:$0xff]  }
  0x75   :  { %1509 = vmatprep.subr.bf16.mxu0 %v4774_v28  ;;  %1673 = vmatprep.subr.bf16.mxu1 %v4776_v29  ;;  %v4851_v18 = vld [vmem:[#allocation5 + $0x268] ss:$16 sps:$4 sm:$0xff]   ;;  %v4856_v19 = vld [vmem:[#allocation5 + $0x284] ss:$16 sps:$4 sm:$0xff]   ;;  %v4859_v20 = vld [vmem:[#allocation5 + $0x28c] ss:$16 sps:$4 sm:$0xff]  }
  0x76   :  { %v4854_v21 = vld [vmem:[#allocation5 + $0x280] ss:$16 sps:$4 sm:$0xff]   ;;  %v4857_v22 = vld [vmem:[#allocation5 + $0x288] ss:$16 sps:$4 sm:$0xff]   ;;  %v4862_v23 = vld [vmem:[#allocation5 + $0x2a4] ss:$16 sps:$4 sm:$0xff]  }
  0x77   :  { %v4865_v24 = vld [vmem:[#allocation5 + $0x2ac] ss:$16 sps:$4 sm:$0xff]   ;;  %v4860_v25 = vld [vmem:[#allocation5 + $0x2a0] ss:$16 sps:$4 sm:$0xff]   ;;  %v4863_v26 = vld [vmem:[#allocation5 + $0x2a8] ss:$16 sps:$4 sm:$0xff]  }
  0x78   :  { %1510 = vmatpush1.bf16.msra.mxu0 %v4778_v30  ;;  %1674 = vmatpush1.bf16.msra.mxu1 %v4779_v31  ;;  %v4868_v27 = vld [vmem:[#allocation5 + $0x2c4] ss:$16 sps:$4 sm:$0xff]   ;;  %v4871_v28 = vld [vmem:[#allocation5 + $0x2cc] ss:$16 sps:$4 sm:$0xff]   ;;  %v4866_v31 = vld [vmem:[#allocation5 + $0x2c0] ss:$16 sps:$4 sm:$0xff]  }
  0x79   :  { %1511 = vmatprep.subr.bf16.mxu0 %v4780_v32  ;;  %1675 = vmatprep.subr.bf16.mxu1 %v4782_v33  ;;  %v5761_v29 = vld [vmem:[#allocation2 + $0x8] sm:$0xff]  ;;  %v4869_v32 = vld [vmem:[#allocation5 + $0x2c8] ss:$16 sps:$4 sm:$0xff]   ;;  %v4874_v33 = vld [vmem:[#allocation5 + $0x2e4] ss:$16 sps:$4 sm:$0xff]   ;;  %s4094_s13 = sshll.u32 %s5641_s12, 4  ;;  %s4095_s13 = int_to_ptr.vmem [resolvable:$true] %s4094_s13 }
  0x7a   :  { %v4108_v30 = vcombine.high %v5761_v29, %v5761_v29  ;;  %v4895_v46 = vld [vmem:[#allocation5 + $0x34c] ss:$16 sps:$4 sm:$0xff]   ;;  %v4893_v48 = vld [vmem:[#allocation5 + $0x348] ss:$16 sps:$4 sm:$0xff]   ;;  %s5601_s1 = scalar_lea.vmem %s4095_s13, 64  ;;  %p5606_p13 = scmp.lt.s32.totalorder %s4095_s13, %s4095_s13 }
  0x7b   :  { %p5602_p12 = scmp.ne.s32.totalorder %s4095_s13, %s5601_s1  ;;  %p5607_p0 = scmp.lt.s32.totalorder %s5601_s1, %s5601_s1 }
  0x7c   :  { %1512 = vmatpush1.bf16.msra.mxu0 %v4784_v34  ;;  %1676 = vmatpush1.bf16.msra.mxu1 %v4785_v35  ;;  %v4877_v34 = vld [vmem:[#allocation5 + $0x2ec] ss:$16 sps:$4 sm:$0xff]   ;;  %v4872_v35 = vld [vmem:[#allocation5 + $0x2e0] ss:$16 sps:$4 sm:$0xff]  }
  0x7d   :  { %1513 = vmatprep.subr.bf16.mxu0 %v4786_v36  ;;  %1677 = vmatprep.subr.bf16.mxu1 %v4788_v37  ;;  %v4875_v36 = vld [vmem:[#allocation5 + $0x2e8] ss:$16 sps:$4 sm:$0xff]   ;;  %v4880_v37 = vld [vmem:[#allocation5 + $0x304] ss:$16 sps:$4 sm:$0xff]   ;;  %p5608_p1 = por %p5607_p0, %p5606_p13 }
  0x7f   :  { %p5609_p2 = pnand %p5608_p1, %p5602_p12 }
  0x80   :  { %1514 = vmatpush1.bf16.msra.mxu0 %v4790_v38  ;;  %1678 = vmatpush1.bf16.msra.mxu1 %v4791_v39  ;;  %v4883_v38 = vld [vmem:[#allocation5 + $0x30c] ss:$16 sps:$4 sm:$0xff]   ;;  %v4878_v39 = vld [vmem:[#allocation5 + $0x300] ss:$16 sps:$4 sm:$0xff]  }
  0x81   :  { %1515 = vmatprep.subr.bf16.mxu0 %v4792_v40  ;;  %1679 = vmatprep.subr.bf16.mxu1 %v4794_v41  ;;  %v4881_v40 = vld [vmem:[#allocation5 + $0x308] ss:$16 sps:$4 sm:$0xff]   ;;  %v4886_v41 = vld [vmem:[#allocation5 + $0x324] ss:$16 sps:$4 sm:$0xff]  }
  0x84   :  { %1516 = vmatpush1.bf16.msra.mxu0 %v4796_v42  ;;  %1680 = vmatpush1.bf16.msra.mxu1 %v4797_v43  ;;  %v4889_v42 = vld [vmem:[#allocation5 + $0x32c] ss:$16 sps:$4 sm:$0xff]   ;;  %v4884_v43 = vld [vmem:[#allocation5 + $0x320] ss:$16 sps:$4 sm:$0xff]  }
  0x85   :  { %1517 = vmatprep.subr.bf16.mxu0 %v4798_v44  ;;  %1681 = vmatprep.subr.bf16.mxu1 %v4800_v45  ;;  %v4887_v44 = vld [vmem:[#allocation5 + $0x328] ss:$16 sps:$4 sm:$0xff]   ;;  %v4892_v45 = vld [vmem:[#allocation5 + $0x344] ss:$16 sps:$4 sm:$0xff]  }
  0x88   :  { %1518 = vmatpush1.bf16.msra.mxu0 %v4802_v47  ;;  %1682 = vmatpush1.bf16.msra.mxu1 %v4803_v49  ;;  %v4890_v47 = vld [vmem:[#allocation5 + $0x340] ss:$16 sps:$4 sm:$0xff]   ;;  %v4898_v49 = vld [vmem:[#allocation5 + $0x364] ss:$16 sps:$4 sm:$0xff]  }
  0x89   :  { %1519 = vmatprep.subr.bf16.mxu0 %v4804_v50  ;;  %1683 = vmatprep.subr.bf16.mxu1 %v4806_v51  ;;  %v4901_v50 = vld [vmem:[#allocation5 + $0x36c] ss:$16 sps:$4 sm:$0xff]   ;;  %v4896_v51 = vld [vmem:[#allocation5 + $0x360] ss:$16 sps:$4 sm:$0xff]  }
  0x8c   :  { %1520 = vmatpush1.bf16.msra.mxu0 %v4808_v52  ;;  %1684 = vmatpush1.bf16.msra.mxu1 %v4809_v53  ;;  %v4899_v52 = vld [vmem:[#allocation5 + $0x368] ss:$16 sps:$4 sm:$0xff]   ;;  %v4904_v53 = vld [vmem:[#allocation5 + $0x384] ss:$16 sps:$4 sm:$0xff]  }
  0x8d   :  { %1521 = vmatprep.subr.bf16.mxu0 %v4810_v54  ;;  %1685 = vmatprep.subr.bf16.mxu1 %v4812_v55  ;;  %v4907_v54 = vld [vmem:[#allocation5 + $0x38c] ss:$16 sps:$4 sm:$0xff]   ;;  %v4902_v55 = vld [vmem:[#allocation5 + $0x380] ss:$16 sps:$4 sm:$0xff]  }
  0x90   :  { %1522 = vmatpush1.bf16.msra.mxu0 %v4814_v56  ;;  %1686 = vmatpush1.bf16.msra.mxu1 %v4815_v57  ;;  %v4905_v56 = vld [vmem:[#allocation5 + $0x388] ss:$16 sps:$4 sm:$0xff]   ;;  %v4910_v57 = vld [vmem:[#allocation5 + $0x3a4] ss:$16 sps:$4 sm:$0xff]  }
  0x91   :  { %1523 = vmatprep.subr.bf16.mxu0 %v4816_v58  ;;  %1687 = vmatprep.subr.bf16.mxu1 %v4818_v59  ;;  %v4913_v58 = vld [vmem:[#allocation5 + $0x3ac] ss:$16 sps:$4 sm:$0xff]   ;;  %v4908_v59 = vld [vmem:[#allocation5 + $0x3a0] ss:$16 sps:$4 sm:$0xff]  }
  0x94   :  { %1524 = vmatpush1.bf16.msra.mxu0 %v4820_v60  ;;  %1688 = vmatpush1.bf16.msra.mxu1 %v4821_v61  ;;  %v4911_v60 = vld [vmem:[#allocation5 + $0x3a8] ss:$16 sps:$4 sm:$0xff]   ;;  %v4916_v61 = vld [vmem:[#allocation5 + $0x3c4] ss:$16 sps:$4 sm:$0xff]  }
  0x95   :  { %1525 = vmatprep.subr.bf16.mxu0 %v4822_v62  ;;  %1689 = vmatprep.subr.bf16.mxu1 %v4824_v63  ;;  %v4919_v62 = vld [vmem:[#allocation5 + $0x3cc] ss:$16 sps:$4 sm:$0xff]   ;;  %v4914_v63 = vld [vmem:[#allocation5 + $0x3c0] ss:$16 sps:$4 sm:$0xff]  }
  0x98   :  { %1526 = vmatpush1.bf16.msra.mxu0 %v4826_v0  ;;  %1690 = vmatpush1.bf16.msra.mxu1 %v4827_v1  ;;  %v4917_v0 = vld [vmem:[#allocation5 + $0x3c8] ss:$16 sps:$4 sm:$0xff]   ;;  %v4922_v1 = vld [vmem:[#allocation5 + $0x3e4] ss:$16 sps:$4 sm:$0xff]  }
  0x99   :  { %1536 = vmatprep.subr.bf16.mxu0 %v4832_v2  ;;  %1700 = vmatprep.subr.bf16.mxu1 %v4835_v3  ;;  %v4925_v2 = vld [vmem:[#allocation5 + $0x3ec] ss:$16 sps:$4 sm:$0xff]   ;;  %v4920_v3 = vld [vmem:[#allocation5 + $0x3e0] ss:$16 sps:$4 sm:$0xff]  }
  0x9b   :  { %1528 = vmatmul.mubr.bf16.vlgmr.msra.gmra.mrb[0].mxu0 %v4105_v4  ;;  %1692 = vmatmul.mubr.bf16.vlgmr.msra.gmra.mrb[0].mxu1 %v4105_v4  ;;  %v4923_v4 = vld [vmem:[#allocation5 + $0x3e8] ss:$16 sps:$4 sm:$0xff]  }
  0x9c   :  { %1537 = vmatpush1.bf16.msra.mxu0 %v4830_v5  ;;  %1701 = vmatpush1.bf16.msra.mxu1 %v4833_v6  ;;  %v4930_v5 = vld [vmem:[#allocation5 + $0x404] ss:$16 sps:$4 sm:$0xff]   ;;  %v4933_v6 = vld [vmem:[#allocation5 + $0x40c] ss:$16 sps:$4 sm:$0xff]  }
  0x9d   :  { %1538 = vmatprep.subr.bf16.mxu0 %v4838_v7  ;;  %1702 = vmatprep.subr.bf16.mxu1 %v4841_v8  ;;  %v4107_v7 = vcombine.low %v5761_v29, %v5761_v29  ;;  %v4928_v8 = vld [vmem:[#allocation5 + $0x400] ss:$16 sps:$4 sm:$0xff]   ;;  %v4963_v29 = vld [vmem:[#allocation5 + $0x4ac] ss:$16 sps:$4 sm:$0xff]  }
  0x9e   :  { %1568 = vmatprep.mubr.bf16.mxu0 %v4108_v30  ;;  %1732 = vmatprep.mubr.bf16.mxu1 %v4108_v30  ;;  %v4958_v30 = vld [vmem:[#allocation5 + $0x4a0] ss:$16 sps:$4 sm:$0xff]  }
  0xa0   :  { %1539 = vmatpush1.bf16.msra.mxu0 %v4836_v9  ;;  %1703 = vmatpush1.bf16.msra.mxu1 %v4839_v10  ;;  %v4931_v9 = vld [vmem:[#allocation5 + $0x408] ss:$16 sps:$4 sm:$0xff]   ;;  %v4936_v10 = vld [vmem:[#allocation5 + $0x424] ss:$16 sps:$4 sm:$0xff]  }
  0xa1   :  { %1540 = vmatprep.subr.bf16.mxu0 %v4844_v11  ;;  %1704 = vmatprep.subr.bf16.mxu1 %v4847_v12  ;;  %v5767_v11 = vld [vmem:[#allocation2 + $0x10] sm:$0xff]  ;;  %v4939_v12 = vld [vmem:[#allocation5 + $0x42c] ss:$16 sps:$4 sm:$0xff]  }
  0xa4   :  { %1541 = vmatpush1.bf16.msra.mxu0 %v4842_v13  ;;  %1705 = vmatpush1.bf16.msra.mxu1 %v4845_v14  ;;  %v4110_v13 = vcombine.high %v5767_v11, %v5767_v11  ;;  %v4934_v14 = vld [vmem:[#allocation5 + $0x420] ss:$16 sps:$4 sm:$0xff]  }
  0xa5   :  { %1542 = vmatprep.subr.bf16.mxu0 %v4850_v15  ;;  %1706 = vmatprep.subr.bf16.mxu1 %v4853_v16  ;;  %v4937_v15 = vld [vmem:[#allocation5 + $0x428] ss:$16 sps:$4 sm:$0xff]   ;;  %v4942_v16 = vld [vmem:[#allocation5 + $0x444] ss:$16 sps:$4 sm:$0xff]  }
  0xa8   :  { %1543 = vmatpush1.bf16.msra.mxu0 %v4848_v17  ;;  %1707 = vmatpush1.bf16.msra.mxu1 %v4851_v18  ;;  %v4945_v17 = vld [vmem:[#allocation5 + $0x44c] ss:$16 sps:$4 sm:$0xff]   ;;  %v4940_v18 = vld [vmem:[#allocation5 + $0x440] ss:$16 sps:$4 sm:$0xff]  }
  0xa9   :  { %1544 = vmatprep.subr.bf16.mxu0 %v4856_v19  ;;  %1708 = vmatprep.subr.bf16.mxu1 %v4859_v20  ;;  %v4943_v19 = vld [vmem:[#allocation5 + $0x448] ss:$16 sps:$4 sm:$0xff]   ;;  %v4948_v20 = vld [vmem:[#allocation5 + $0x464] ss:$16 sps:$4 sm:$0xff]  }
  0xac   :  { %1545 = vmatpush1.bf16.msra.mxu0 %v4854_v21  ;;  %1709 = vmatpush1.bf16.msra.mxu1 %v4857_v22  ;;  %v4951_v21 = vld [vmem:[#allocation5 + $0x46c] ss:$16 sps:$4 sm:$0xff]   ;;  %v4946_v22 = vld [vmem:[#allocation5 + $0x460] ss:$16 sps:$4 sm:$0xff]  }
  0xad   :  { %1546 = vmatprep.subr.bf16.mxu0 %v4862_v23  ;;  %1710 = vmatprep.subr.bf16.mxu1 %v4865_v24  ;;  %v4949_v23 = vld [vmem:[#allocation5 + $0x468] ss:$16 sps:$4 sm:$0xff]   ;;  %v4954_v24 = vld [vmem:[#allocation5 + $0x484] ss:$16 sps:$4 sm:$0xff]  }
  0xb0   :  { %1547 = vmatpush1.bf16.msra.mxu0 %v4860_v25  ;;  %1711 = vmatpush1.bf16.msra.mxu1 %v4863_v26  ;;  %v4957_v25 = vld [vmem:[#allocation5 + $0x48c] ss:$16 sps:$4 sm:$0xff]   ;;  %v4952_v26 = vld [vmem:[#allocation5 + $0x480] ss:$16 sps:$4 sm:$0xff]  }
  0xb1   :  { %1548 = vmatprep.subr.bf16.mxu0 %v4868_v27  ;;  %1712 = vmatprep.subr.bf16.mxu1 %v4871_v28  ;;  %v4955_v27 = vld [vmem:[#allocation5 + $0x488] ss:$16 sps:$4 sm:$0xff]   ;;  %v4960_v28 = vld [vmem:[#allocation5 + $0x4a4] ss:$16 sps:$4 sm:$0xff]  }
  0xb4   :  { %1549 = vmatpush1.bf16.msra.mxu0 %v4866_v31  ;;  %1713 = vmatpush1.bf16.msra.mxu1 %v4869_v32  ;;  %v4961_v31 = vld [vmem:[#allocation5 + $0x4a8] ss:$16 sps:$4 sm:$0xff]   ;;  %v4966_v32 = vld [vmem:[#allocation5 + $0x4c4] ss:$16 sps:$4 sm:$0xff]  }
  0xb5   :  { %1550 = vmatprep.subr.bf16.mxu0 %v4874_v33  ;;  %1714 = vmatprep.subr.bf16.mxu1 %v4877_v34  ;;  %v4969_v33 = vld [vmem:[#allocation5 + $0x4cc] ss:$16 sps:$4 sm:$0xff]   ;;  %v4964_v34 = vld [vmem:[#allocation5 + $0x4c0] ss:$16 sps:$4 sm:$0xff]  }
  0xb8   :  { %1551 = vmatpush1.bf16.msra.mxu0 %v4872_v35  ;;  %1715 = vmatpush1.bf16.msra.mxu1 %v4875_v36  ;;  %v4967_v35 = vld [vmem:[#allocation5 + $0x4c8] ss:$16 sps:$4 sm:$0xff]   ;;  %v4972_v36 = vld [vmem:[#allocation5 + $0x4e4] ss:$16 sps:$4 sm:$0xff]  }
  0xb9   :  { %1552 = vmatprep.subr.bf16.mxu0 %v4880_v37  ;;  %1716 = vmatprep.subr.bf16.mxu1 %v4883_v38  ;;  %v4975_v37 = vld [vmem:[#allocation5 + $0x4ec] ss:$16 sps:$4 sm:$0xff]   ;;  %v4970_v38 = vld [vmem:[#allocation5 + $0x4e0] ss:$16 sps:$4 sm:$0xff]  }
  0xbc   :  { %1553 = vmatpush1.bf16.msra.mxu0 %v4878_v39  ;;  %1717 = vmatpush1.bf16.msra.mxu1 %v4881_v40  ;;  %v4973_v39 = vld [vmem:[#allocation5 + $0x4e8] ss:$16 sps:$4 sm:$0xff]   ;;  %v4978_v40 = vld [vmem:[#allocation5 + $0x504] ss:$16 sps:$4 sm:$0xff]  }
  0xbd   :  { %1554 = vmatprep.subr.bf16.mxu0 %v4886_v41  ;;  %1718 = vmatprep.subr.bf16.mxu1 %v4889_v42  ;;  %v4981_v41 = vld [vmem:[#allocation5 + $0x50c] ss:$16 sps:$4 sm:$0xff]   ;;  %v4976_v42 = vld [vmem:[#allocation5 + $0x500] ss:$16 sps:$4 sm:$0xff]  }
  0xc0   :  { %1555 = vmatpush1.bf16.msra.mxu0 %v4884_v43  ;;  %1719 = vmatpush1.bf16.msra.mxu1 %v4887_v44  ;;  %v4979_v43 = vld [vmem:[#allocation5 + $0x508] ss:$16 sps:$4 sm:$0xff]   ;;  %v4984_v44 = vld [vmem:[#allocation5 + $0x524] ss:$16 sps:$4 sm:$0xff]  }
  0xc1   :  { %1556 = vmatprep.subr.bf16.mxu0 %v4892_v45  ;;  %1720 = vmatprep.subr.bf16.mxu1 %v4895_v46  ;;  %v4987_v45 = vld [vmem:[#allocation5 + $0x52c] ss:$16 sps:$4 sm:$0xff]   ;;  %v4982_v46 = vld [vmem:[#allocation5 + $0x520] ss:$16 sps:$4 sm:$0xff]  }
  0xc4   :  { %1557 = vmatpush1.bf16.msra.mxu0 %v4890_v47  ;;  %1721 = vmatpush1.bf16.msra.mxu1 %v4893_v48  ;;  %v4985_v47 = vld [vmem:[#allocation5 + $0x528] ss:$16 sps:$4 sm:$0xff]   ;;  %v4990_v48 = vld [vmem:[#allocation5 + $0x544] ss:$16 sps:$4 sm:$0xff]  }
  0xc5   :  { %1558 = vmatprep.subr.bf16.mxu0 %v4898_v49  ;;  %1722 = vmatprep.subr.bf16.mxu1 %v4901_v50  ;;  %v4993_v49 = vld [vmem:[#allocation5 + $0x54c] ss:$16 sps:$4 sm:$0xff]   ;;  %v4988_v50 = vld [vmem:[#allocation5 + $0x540] ss:$16 sps:$4 sm:$0xff]  }
  0xc8   :  { %1559 = vmatpush1.bf16.msra.mxu0 %v4896_v51  ;;  %1723 = vmatpush1.bf16.msra.mxu1 %v4899_v52  ;;  %v4991_v51 = vld [vmem:[#allocation5 + $0x548] ss:$16 sps:$4 sm:$0xff]   ;;  %v4996_v52 = vld [vmem:[#allocation5 + $0x564] ss:$16 sps:$4 sm:$0xff]  }
  0xc9   :  { %1560 = vmatprep.subr.bf16.mxu0 %v4904_v53  ;;  %1724 = vmatprep.subr.bf16.mxu1 %v4907_v54  ;;  %v4999_v53 = vld [vmem:[#allocation5 + $0x56c] ss:$16 sps:$4 sm:$0xff]   ;;  %v4994_v54 = vld [vmem:[#allocation5 + $0x560] ss:$16 sps:$4 sm:$0xff]  }
  0xcc   :  { %1561 = vmatpush1.bf16.msra.mxu0 %v4902_v55  ;;  %1725 = vmatpush1.bf16.msra.mxu1 %v4905_v56  ;;  %v4997_v55 = vld [vmem:[#allocation5 + $0x568] ss:$16 sps:$4 sm:$0xff]   ;;  %v5002_v56 = vld [vmem:[#allocation5 + $0x584] ss:$16 sps:$4 sm:$0xff]  }
  0xcd   :  { %1562 = vmatprep.subr.bf16.mxu0 %v4910_v57  ;;  %1726 = vmatprep.subr.bf16.mxu1 %v4913_v58  ;;  %v5005_v57 = vld [vmem:[#allocation5 + $0x58c] ss:$16 sps:$4 sm:$0xff]   ;;  %v5000_v58 = vld [vmem:[#allocation5 + $0x580] ss:$16 sps:$4 sm:$0xff]  }
  0xd0   :  { %1563 = vmatpush1.bf16.msra.mxu0 %v4908_v59  ;;  %1727 = vmatpush1.bf16.msra.mxu1 %v4911_v60  ;;  %v5003_v59 = vld [vmem:[#allocation5 + $0x588] ss:$16 sps:$4 sm:$0xff]   ;;  %v5008_v60 = vld [vmem:[#allocation5 + $0x5a4] ss:$16 sps:$4 sm:$0xff]  }
  0xd1   :  { %1564 = vmatprep.subr.bf16.mxu0 %v4916_v61  ;;  %1728 = vmatprep.subr.bf16.mxu1 %v4919_v62  ;;  %v5011_v61 = vld [vmem:[#allocation5 + $0x5ac] ss:$16 sps:$4 sm:$0xff]   ;;  %v5006_v62 = vld [vmem:[#allocation5 + $0x5a0] ss:$16 sps:$4 sm:$0xff]  }
  0xd4   :  { %1565 = vmatpush1.bf16.msra.mxu0 %v4914_v63  ;;  %1729 = vmatpush1.bf16.msra.mxu1 %v4917_v0  ;;  %v5009_v63 = vld [vmem:[#allocation5 + $0x5a8] ss:$16 sps:$4 sm:$0xff]   ;;  %v5014_v0 = vld [vmem:[#allocation5 + $0x5c4] ss:$16 sps:$4 sm:$0xff]  }
  0xd5   :  { %1566 = vmatprep.subr.bf16.mxu0 %v4922_v1  ;;  %1730 = vmatprep.subr.bf16.mxu1 %v4925_v2  ;;  %v5017_v1 = vld [vmem:[#allocation5 + $0x5cc] ss:$16 sps:$4 sm:$0xff]   ;;  %v5012_v2 = vld [vmem:[#allocation5 + $0x5c0] ss:$16 sps:$4 sm:$0xff]  }
  0xd8   :  { %1567 = vmatpush1.bf16.msra.mxu0 %v4920_v3  ;;  %1731 = vmatpush1.bf16.msra.mxu1 %v4923_v4  ;;  %v5015_v3 = vld [vmem:[#allocation5 + $0x5c8] ss:$16 sps:$4 sm:$0xff]   ;;  %v5020_v4 = vld [vmem:[#allocation5 + $0x5e4] ss:$16 sps:$4 sm:$0xff]  }
  0xd9   :  { %1577 = vmatprep.subr.bf16.mxu0 %v4930_v5  ;;  %1741 = vmatprep.subr.bf16.mxu1 %v4933_v6  ;;  %v5023_v5 = vld [vmem:[#allocation5 + $0x5ec] ss:$16 sps:$4 sm:$0xff]   ;;  %v5018_v6 = vld [vmem:[#allocation5 + $0x5e0] ss:$16 sps:$4 sm:$0xff]  }
  0xdb   :  { %1569 = vmatmul.mubr.bf16.vlgmr.msra.gmra.mrb[0].mxu0 %v4107_v7  ;;  %1733 = vmatmul.mubr.bf16.vlgmr.msra.gmra.mrb[0].mxu1 %v4107_v7  ;;  %v5021_v7 = vld [vmem:[#allocation5 + $0x5e8] ss:$16 sps:$4 sm:$0xff]  }
  0xdc   :  { %1578 = vmatpush1.bf16.msra.mxu0 %v4928_v8  ;;  %1742 = vmatpush1.bf16.msra.mxu1 %v4931_v9  ;;  %v5028_v8 = vld [vmem:[#allocation5 + $0x604] ss:$16 sps:$4 sm:$0xff]   ;;  %v5031_v9 = vld [vmem:[#allocation5 + $0x60c] ss:$16 sps:$4 sm:$0xff]  }
  0xdd   :  { %1579 = vmatprep.subr.bf16.mxu0 %v4936_v10  ;;  %1743 = vmatprep.subr.bf16.mxu1 %v4939_v12  ;;  %v5026_v10 = vld [vmem:[#allocation5 + $0x600] ss:$16 sps:$4 sm:$0xff]   ;;  %v5029_v12 = vld [vmem:[#allocation5 + $0x608] ss:$16 sps:$4 sm:$0xff]  }
  0xde   :  { %1609 = vmatprep.mubr.bf16.mxu0 %v4110_v13  ;;  %1773 = vmatprep.mubr.bf16.mxu1 %v4110_v13  ;;  %v4109_v13 = vcombine.low %v5767_v11, %v5767_v11  ;;  %v5046_v11 = vld [vmem:[#allocation5 + $0x664] ss:$16 sps:$4 sm:$0xff]  }
  0xe0   :  { %1580 = vmatpush1.bf16.msra.mxu0 %v4934_v14  ;;  %1744 = vmatpush1.bf16.msra.mxu1 %v4937_v15  ;;  %v5034_v14 = vld [vmem:[#allocation5 + $0x624] ss:$16 sps:$4 sm:$0xff]   ;;  %v5037_v15 = vld [vmem:[#allocation5 + $0x62c] ss:$16 sps:$4 sm:$0xff]  }
  0xe1   :  { %1581 = vmatprep.subr.bf16.mxu0 %v4942_v16  ;;  %1745 = vmatprep.subr.bf16.mxu1 %v4945_v17  ;;  %v5032_v16 = vld [vmem:[#allocation5 + $0x620] ss:$16 sps:$4 sm:$0xff]   ;;  %v5035_v17 = vld [vmem:[#allocation5 + $0x628] ss:$16 sps:$4 sm:$0xff]  }
  0xe4   :  { %1582 = vmatpush1.bf16.msra.mxu0 %v4940_v18  ;;  %1746 = vmatpush1.bf16.msra.mxu1 %v4943_v19  ;;  %v5040_v18 = vld [vmem:[#allocation5 + $0x644] ss:$16 sps:$4 sm:$0xff]   ;;  %v5043_v19 = vld [vmem:[#allocation5 + $0x64c] ss:$16 sps:$4 sm:$0xff]  }
  0xe5   :  { %1583 = vmatprep.subr.bf16.mxu0 %v4948_v20  ;;  %1747 = vmatprep.subr.bf16.mxu1 %v4951_v21  ;;  %v5038_v20 = vld [vmem:[#allocation5 + $0x640] ss:$16 sps:$4 sm:$0xff]   ;;  %v5041_v21 = vld [vmem:[#allocation5 + $0x648] ss:$16 sps:$4 sm:$0xff]  }
  0xe8   :  { %1584 = vmatpush1.bf16.msra.mxu0 %v4946_v22  ;;  %1748 = vmatpush1.bf16.msra.mxu1 %v4949_v23  ;;  %v5640_v22 = vmov 0   ;;  %v5049_v23 = vld [vmem:[#allocation5 + $0x66c] ss:$16 sps:$4 sm:$0xff]  }
  0xe9   :  { %1585 = vmatprep.subr.bf16.mxu0 %v4954_v24  ;;  %1749 = vmatprep.subr.bf16.mxu1 %v4957_v25  ;;  %v5044_v24 = vld [vmem:[#allocation5 + $0x660] ss:$16 sps:$4 sm:$0xff]   ;;  %v5047_v25 = vld [vmem:[#allocation5 + $0x668] ss:$16 sps:$4 sm:$0xff]  }
  0xec   :  { %1586 = vmatpush1.bf16.msra.mxu0 %v4952_v26  ;;  %1750 = vmatpush1.bf16.msra.mxu1 %v4955_v27  ;;  %v5052_v26 = vld [vmem:[#allocation5 + $0x684] ss:$16 sps:$4 sm:$0xff]   ;;  %v5055_v27 = vld [vmem:[#allocation5 + $0x68c] ss:$16 sps:$4 sm:$0xff]  }
  0xed   :  { %1587 = vmatprep.subr.bf16.mxu0 %v4960_v28  ;;  %1751 = vmatprep.subr.bf16.mxu1 %v4963_v29  ;;  %v5050_v28 = vld [vmem:[#allocation5 + $0x680] ss:$16 sps:$4 sm:$0xff]   ;;  %v5053_v29 = vld [vmem:[#allocation5 + $0x688] ss:$16 sps:$4 sm:$0xff]  }
  0xf0   :  { %1588 = vmatpush1.bf16.msra.mxu0 %v4958_v30  ;;  %1752 = vmatpush1.bf16.msra.mxu1 %v4961_v31  ;;  %v5058_v30 = vld [vmem:[#allocation5 + $0x6a4] ss:$16 sps:$4 sm:$0xff]   ;;  %v5061_v31 = vld [vmem:[#allocation5 + $0x6ac] ss:$16 sps:$4 sm:$0xff]  }
  0xf1   :  { %1589 = vmatprep.subr.bf16.mxu0 %v4966_v32  ;;  %1753 = vmatprep.subr.bf16.mxu1 %v4969_v33  ;;  %v5056_v32 = vld [vmem:[#allocation5 + $0x6a0] ss:$16 sps:$4 sm:$0xff]   ;;  %v5059_v33 = vld [vmem:[#allocation5 + $0x6a8] ss:$16 sps:$4 sm:$0xff]  }
  0xf4   :  { %1590 = vmatpush1.bf16.msra.mxu0 %v4964_v34  ;;  %1754 = vmatpush1.bf16.msra.mxu1 %v4967_v35  ;;  %v5064_v34 = vld [vmem:[#allocation5 + $0x6c4] ss:$16 sps:$4 sm:$0xff]   ;;  %v5067_v35 = vld [vmem:[#allocation5 + $0x6cc] ss:$16 sps:$4 sm:$0xff]  }
  0xf5   :  { %1591 = vmatprep.subr.bf16.mxu0 %v4972_v36  ;;  %1755 = vmatprep.subr.bf16.mxu1 %v4975_v37  ;;  %v5062_v36 = vld [vmem:[#allocation5 + $0x6c0] ss:$16 sps:$4 sm:$0xff]   ;;  %v5065_v37 = vld [vmem:[#allocation5 + $0x6c8] ss:$16 sps:$4 sm:$0xff]  }
  0xf8   :  { %1592 = vmatpush1.bf16.msra.mxu0 %v4970_v38  ;;  %1756 = vmatpush1.bf16.msra.mxu1 %v4973_v39  ;;  %v5070_v38 = vld [vmem:[#allocation5 + $0x6e4] ss:$16 sps:$4 sm:$0xff]   ;;  %v5073_v39 = vld [vmem:[#allocation5 + $0x6ec] ss:$16 sps:$4 sm:$0xff]  }
  0xf9   :  { %1593 = vmatprep.subr.bf16.mxu0 %v4978_v40  ;;  %1757 = vmatprep.subr.bf16.mxu1 %v4981_v41  ;;  %v5068_v40 = vld [vmem:[#allocation5 + $0x6e0] ss:$16 sps:$4 sm:$0xff]   ;;  %v5071_v41 = vld [vmem:[#allocation5 + $0x6e8] ss:$16 sps:$4 sm:$0xff]  }
  0xfc   :  { %1594 = vmatpush1.bf16.msra.mxu0 %v4976_v42  ;;  %1758 = vmatpush1.bf16.msra.mxu1 %v4979_v43  ;;  %v5077_v42 = vld [vmem:[#allocation7 + $0x4] ss:$16 sps:$4 sm:$0xff]   ;;  %v5080_v43 = vld [vmem:[#allocation7 + $0xc] ss:$16 sps:$4 sm:$0xff]  }
  0xfd   :  { %1595 = vmatprep.subr.bf16.mxu0 %v4984_v44  ;;  %1759 = vmatprep.subr.bf16.mxu1 %v4987_v45  ;;  %v5074_v44 = vld [vmem:[#allocation2 + $0x18] ss:$0 sps:$4 sm:$0xff]   ;;  %v5075_v45 = vld [vmem:[#allocation7] ss:$16 sps:$4 sm:$0xff]  }
 0x100   :  { %1596 = vmatpush1.bf16.msra.mxu0 %v4982_v46  ;;  %1760 = vmatpush1.bf16.msra.mxu1 %v4985_v47  ;;  %v5078_v46 = vld [vmem:[#allocation7 + $0x8] ss:$16 sps:$4 sm:$0xff]   ;;  %v5083_v47 = vld [vmem:[#allocation7 + $0x24] ss:$16 sps:$4 sm:$0xff]  }
 0x101   :  { %1597 = vmatprep.subr.bf16.mxu0 %v4990_v48  ;;  %1761 = vmatprep.subr.bf16.mxu1 %v4993_v49  ;;  %v5086_v48 = vld [vmem:[#allocation7 + $0x2c] ss:$16 sps:$4 sm:$0xff]   ;;  %v5081_v49 = vld [vmem:[#allocation7 + $0x20] ss:$16 sps:$4 sm:$0xff]  }
 0x104   :  { %1598 = vmatpush1.bf16.msra.mxu0 %v4988_v50  ;;  %1762 = vmatpush1.bf16.msra.mxu1 %v4991_v51  ;;  %v5084_v50 = vld [vmem:[#allocation7 + $0x28] ss:$16 sps:$4 sm:$0xff]   ;;  %v5089_v51 = vld [vmem:[#allocation7 + $0x44] ss:$16 sps:$4 sm:$0xff]  }
 0x105   :  { %1599 = vmatprep.subr.bf16.mxu0 %v4996_v52  ;;  %1763 = vmatprep.subr.bf16.mxu1 %v4999_v53  ;;  %v5092_v52 = vld [vmem:[#allocation7 + $0x4c] ss:$16 sps:$4 sm:$0xff]   ;;  %v5087_v53 = vld [vmem:[#allocation7 + $0x40] ss:$16 sps:$4 sm:$0xff]  }
 0x108   :  { %1600 = vmatpush1.bf16.msra.mxu0 %v4994_v54  ;;  %1764 = vmatpush1.bf16.msra.mxu1 %v4997_v55  ;;  %v5090_v54 = vld [vmem:[#allocation7 + $0x48] ss:$16 sps:$4 sm:$0xff]   ;;  %v5095_v55 = vld [vmem:[#allocation7 + $0x64] ss:$16 sps:$4 sm:$0xff]  }
 0x109   :  { %1601 = vmatprep.subr.bf16.mxu0 %v5002_v56  ;;  %1765 = vmatprep.subr.bf16.mxu1 %v5005_v57  ;;  %v5098_v56 = vld [vmem:[#allocation7 + $0x6c] ss:$16 sps:$4 sm:$0xff]   ;;  %v5093_v57 = vld [vmem:[#allocation7 + $0x60] ss:$16 sps:$4 sm:$0xff]  }
 0x10c   :  { %1602 = vmatpush1.bf16.msra.mxu0 %v5000_v58  ;;  %1766 = vmatpush1.bf16.msra.mxu1 %v5003_v59  ;;  %v5096_v58 = vld [vmem:[#allocation7 + $0x68] ss:$16 sps:$4 sm:$0xff]   ;;  %v5101_v59 = vld [vmem:[#allocation7 + $0x84] ss:$16 sps:$4 sm:$0xff]  }
 0x10d   :  { %1603 = vmatprep.subr.bf16.mxu0 %v5008_v60  ;;  %1767 = vmatprep.subr.bf16.mxu1 %v5011_v61  ;;  %v5104_v60 = vld [vmem:[#allocation7 + $0x8c] ss:$16 sps:$4 sm:$0xff]   ;;  %v5099_v61 = vld [vmem:[#allocation7 + $0x80] ss:$16 sps:$4 sm:$0xff]  }
 0x110   :  { %1604 = vmatpush1.bf16.msra.mxu0 %v5006_v62  ;;  %1768 = vmatpush1.bf16.msra.mxu1 %v5009_v63  ;;  %v5102_v62 = vld [vmem:[#allocation7 + $0x88] ss:$16 sps:$4 sm:$0xff]   ;;  %v5107_v63 = vld [vmem:[#allocation7 + $0xa4] ss:$16 sps:$4 sm:$0xff]  }
 0x111   :  { %1605 = vmatprep.subr.bf16.mxu0 %v5014_v0  ;;  %1769 = vmatprep.subr.bf16.mxu1 %v5017_v1  ;;  %v5110_v0 = vld [vmem:[#allocation7 + $0xac] ss:$16 sps:$4 sm:$0xff]   ;;  %v5105_v1 = vld [vmem:[#allocation7 + $0xa0] ss:$16 sps:$4 sm:$0xff]  }
 0x114   :  { %1606 = vmatpush1.bf16.msra.mxu0 %v5012_v2  ;;  %1770 = vmatpush1.bf16.msra.mxu1 %v5015_v3  ;;  %v5108_v2 = vld [vmem:[#allocation7 + $0xa8] ss:$16 sps:$4 sm:$0xff]   ;;  %v5113_v3 = vld [vmem:[#allocation7 + $0xc4] ss:$16 sps:$4 sm:$0xff]  }
 0x115   :  { %1607 = vmatprep.subr.bf16.mxu0 %v5020_v4  ;;  %1771 = vmatprep.subr.bf16.mxu1 %v5023_v5  ;;  %v5116_v4 = vld [vmem:[#allocation7 + $0xcc] ss:$16 sps:$4 sm:$0xff]   ;;  %v5111_v5 = vld [vmem:[#allocation7 + $0xc0] ss:$16 sps:$4 sm:$0xff]  }
 0x118   :  { %1608 = vmatpush1.bf16.msra.mxu0 %v5018_v6  ;;  %1772 = vmatpush1.bf16.msra.mxu1 %v5021_v7  ;;  %v5114_v6 = vld [vmem:[#allocation7 + $0xc8] ss:$16 sps:$4 sm:$0xff]   ;;  %v5119_v7 = vld [vmem:[#allocation7 + $0xe4] ss:$16 sps:$4 sm:$0xff]  }
 0x119   :  { %1618 = vmatprep.subr.bf16.mxu0 %v5028_v8  ;;  %1782 = vmatprep.subr.bf16.mxu1 %v5031_v9  ;;  %v5122_v8 = vld [vmem:[#allocation7 + $0xec] ss:$16 sps:$4 sm:$0xff]   ;;  %v5117_v9 = vld [vmem:[#allocation7 + $0xe0] ss:$16 sps:$4 sm:$0xff]  }
 0x11b   :  { %1610 = vmatmul.mubr.bf16.vlgmr.msra.gmra.mrb[0].mxu0 %v4109_v13  ;;  %1774 = vmatmul.mubr.bf16.vlgmr.msra.gmra.mrb[0].mxu1 %v4109_v13  ;;  %v5128_v13 = vld [vmem:[#allocation7 + $0x10c] ss:$16 sps:$4 sm:$0xff]  }
 0x11c   :  { %1619 = vmatpush1.bf16.msra.mxu0 %v5026_v10  ;;  %1783 = vmatpush1.bf16.msra.mxu1 %v5029_v12  ;;  %v5120_v10 = vld [vmem:[#allocation7 + $0xe8] ss:$16 sps:$4 sm:$0xff]   ;;  %v5125_v12 = vld [vmem:[#allocation7 + $0x104] ss:$16 sps:$4 sm:$0xff]  }
 0x11d   :  { %1620 = vmatprep.subr.bf16.mxu0 %v5034_v14  ;;  %1784 = vmatprep.subr.bf16.mxu1 %v5037_v15  ;;  %v5123_v14 = vld [vmem:[#allocation7 + $0x100] ss:$16 sps:$4 sm:$0xff]   ;;  %v5126_v15 = vld [vmem:[#allocation7 + $0x108] ss:$16 sps:$4 sm:$0xff]  }
 0x11e   :  { %1650 = vmatprep.mubr.bf16.mxu0 %v5640_v22  ;;  %1814 = vmatprep.mubr.bf16.mxu1 %v5640_v22  ;;  %v5135_v22 = vld [vmem:[#allocation7 + $0x140] ss:$16 sps:$4 sm:$0xff]  }
 0x120   :  { %1621 = vmatpush1.bf16.msra.mxu0 %v5032_v16  ;;  %1785 = vmatpush1.bf16.msra.mxu1 %v5035_v17  ;;  %v5131_v16 = vld [vmem:[#allocation7 + $0x124] ss:$16 sps:$4 sm:$0xff]   ;;  %v5134_v17 = vld [vmem:[#allocation7 + $0x12c] ss:$16 sps:$4 sm:$0xff]  }
 0x121   :  { %1622 = vmatprep.subr.bf16.mxu0 %v5040_v18  ;;  %1786 = vmatprep.subr.bf16.mxu1 %v5043_v19  ;;  %v5129_v18 = vld [vmem:[#allocation7 + $0x120] ss:$16 sps:$4 sm:$0xff]   ;;  %v5132_v19 = vld [vmem:[#allocation7 + $0x128] ss:$16 sps:$4 sm:$0xff]  }
 0x124   :  { %1623 = vmatpush1.bf16.msra.mxu0 %v5038_v20  ;;  %1787 = vmatpush1.bf16.msra.mxu1 %v5041_v21  ;;  %v5137_v20 = vld [vmem:[#allocation7 + $0x144] ss:$16 sps:$4 sm:$0xff]   ;;  %v5140_v21 = vld [vmem:[#allocation7 + $0x14c] ss:$16 sps:$4 sm:$0xff]  }
 0x125   :  { %1624 = vmatprep.subr.bf16.mxu0 %v5046_v11  ;;  %1788 = vmatprep.subr.bf16.mxu1 %v5049_v23  ;;  %v5138_v11 = vld [vmem:[#allocation7 + $0x148] ss:$16 sps:$4 sm:$0xff]   ;;  %v5143_v23 = vld [vmem:[#allocation7 + $0x164] ss:$16 sps:$4 sm:$0xff]  }
 0x128   :  { %1625 = vmatpush1.bf16.msra.mxu0 %v5044_v24  ;;  %1789 = vmatpush1.bf16.msra.mxu1 %v5047_v25  ;;  %v5146_v24 = vld [vmem:[#allocation7 + $0x16c] ss:$16 sps:$4 sm:$0xff]   ;;  %v5141_v25 = vld [vmem:[#allocation7 + $0x160] ss:$16 sps:$4 sm:$0xff]  }
 0x129   :  { %1626 = vmatprep.subr.bf16.mxu0 %v5052_v26  ;;  %1790 = vmatprep.subr.bf16.mxu1 %v5055_v27  ;;  %v5144_v26 = vld [vmem:[#allocation7 + $0x168] ss:$16 sps:$4 sm:$0xff]   ;;  %v5149_v27 = vld [vmem:[#allocation7 + $0x184] ss:$16 sps:$4 sm:$0xff]  }
 0x12c   :  { %1627 = vmatpush1.bf16.msra.mxu0 %v5050_v28  ;;  %1791 = vmatpush1.bf16.msra.mxu1 %v5053_v29  ;;  %v5152_v28 = vld [vmem:[#allocation7 + $0x18c] ss:$16 sps:$4 sm:$0xff]   ;;  %v5147_v29 = vld [vmem:[#allocation7 + $0x180] ss:$16 sps:$4 sm:$0xff]  }
 0x12d   :  { %1628 = vmatprep.subr.bf16.mxu0 %v5058_v30  ;;  %1792 = vmatprep.subr.bf16.mxu1 %v5061_v31  ;;  %v5150_v30 = vld [vmem:[#allocation7 + $0x188] ss:$16 sps:$4 sm:$0xff]   ;;  %v5155_v31 = vld [vmem:[#allocation7 + $0x1a4] ss:$16 sps:$4 sm:$0xff]  }
 0x130   :  { %1629 = vmatpush1.bf16.msra.mxu0 %v5056_v32  ;;  %1793 = vmatpush1.bf16.msra.mxu1 %v5059_v33  ;;  %v5158_v32 = vld [vmem:[#allocation7 + $0x1ac] ss:$16 sps:$4 sm:$0xff]   ;;  %v5153_v33 = vld [vmem:[#allocation7 + $0x1a0] ss:$16 sps:$4 sm:$0xff]  }
 0x131   :  { %1630 = vmatprep.subr.bf16.mxu0 %v5064_v34  ;;  %1794 = vmatprep.subr.bf16.mxu1 %v5067_v35  ;;  %v5156_v34 = vld [vmem:[#allocation7 + $0x1a8] ss:$16 sps:$4 sm:$0xff]   ;;  %v5161_v35 = vld [vmem:[#allocation7 + $0x1c4] ss:$16 sps:$4 sm:$0xff]  }
 0x134   :  { %1631 = vmatpush1.bf16.msra.mxu0 %v5062_v36  ;;  %1795 = vmatpush1.bf16.msra.mxu1 %v5065_v37  ;;  %v5164_v36 = vld [vmem:[#allocation7 + $0x1cc] ss:$16 sps:$4 sm:$0xff]   ;;  %v5159_v37 = vld [vmem:[#allocation7 + $0x1c0] ss:$16 sps:$4 sm:$0xff]  }
 0x135   :  { %1632 = vmatprep.subr.bf16.mxu0 %v5070_v38  ;;  %1796 = vmatprep.subr.bf16.mxu1 %v5073_v39  ;;  %v5162_v38 = vld [vmem:[#allocation7 + $0x1c8] ss:$16 sps:$4 sm:$0xff]   ;;  %v5167_v39 = vld [vmem:[#allocation7 + $0x1e4] ss:$16 sps:$4 sm:$0xff]  }
 0x138   :  { %1633 = vmatpush1.bf16.msra.mxu0 %v5068_v40  ;;  %1797 = vmatpush1.bf16.msra.mxu1 %v5071_v41  ;;  %v5170_v40 = vld [vmem:[#allocation7 + $0x1ec] ss:$16 sps:$4 sm:$0xff]   ;;  %v5165_v41 = vld [vmem:[#allocation7 + $0x1e0] ss:$16 sps:$4 sm:$0xff]  }
 0x139   :  { %2617 = vmatprep.subr.bf16.mxu0 %v5077_v42  ;;  %2699 = vmatprep.subr.bf16.mxu1 %v5080_v43  ;;  %v5168_v42 = vld [vmem:[#allocation7 + $0x1e8] ss:$16 sps:$4 sm:$0xff]   ;;  %v5173_v43 = vld [vmem:[#allocation7 + $0x204] ss:$16 sps:$4 sm:$0xff]  }
 0x13b   :  { %1651 = vmatmul.mubr.bf16.vlgmr.msra.gmra.mrb[0].mxu0 %v5074_v44  ;;  %1815 = vmatmul.mubr.bf16.vlgmr.msra.gmra.mrb[0].mxu1 %v5074_v44  ;;  %v5176_v44 = vld [vmem:[#allocation7 + $0x20c] ss:$16 sps:$4 sm:$0xff]  }
 0x13c   :  { %2618 = vmatpush1.bf16.msra.mxu0 %v5075_v45  ;;  %2700 = vmatpush1.bf16.msra.mxu1 %v5078_v46  ;;  %v330_v45 = vlaneseq }
 0x13d   :  { %2619 = vmatprep.subr.bf16.mxu0 %v5083_v47  ;;  %2701 = vmatprep.subr.bf16.mxu1 %v5086_v48  ;;  %v5781_v48 = vld [vmem:[%s5843_s2] sm:$0xf] }
 0x13e   :  { %v5773_v46 = vshrl.u32 %v330_v45, 7  ;;  %v5234_v45 = vld [vmem:[#allocation7 + $0x348] ss:$16 sps:$4 sm:$0xff]  }
 0x140   :  { %2620 = vmatpush1.bf16.msra.mxu0 %v5081_v49  ;;  %2702 = vmatpush1.bf16.msra.mxu1 %v5084_v50  ;;  %v5776_v47 = vsub.s32 0, %v5773_v46  ;;  %v5784_v49 = vsub.s32 1, %v5773_v46  ;;  %v5787_v50 = vsub.s32 3, %v5773_v46 }
 0x141   :  { %2621 = vmatprep.subr.bf16.mxu0 %v5089_v51  ;;  %2703 = vmatprep.subr.bf16.mxu1 %v5092_v52 }
 0x142   :  { %v333_v51 = vrot.slane %v5781_v48, %v5776_v47  ;;  %v337_v52 = vrot.slane %v5781_v48, %v5784_v49 }
 0x144   :  { %2622 = vmatpush1.bf16.msra.mxu0 %v5087_v53  ;;  %2704 = vmatpush1.bf16.msra.mxu1 %v5090_v54  ;;  %v345_v53 = vrot.slane %v5781_v48, %v5787_v50 }
 0x145   :  { %2623 = vmatprep.subr.bf16.mxu0 %v5095_v55  ;;  %2705 = vmatprep.subr.bf16.mxu1 %v5098_v56 }
 0x148   :  { %2624 = vmatpush1.bf16.msra.mxu0 %v5093_v57  ;;  %2706 = vmatpush1.bf16.msra.mxu1 %v5096_v58 }
 0x149   :  { %2625 = vmatprep.subr.bf16.mxu0 %v5101_v59  ;;  %2707 = vmatprep.subr.bf16.mxu1 %v5104_v60 }
 0x14c   :  { %2626 = vmatpush1.bf16.msra.mxu0 %v5099_v61  ;;  %2708 = vmatpush1.bf16.msra.mxu1 %v5102_v62 }
 0x14d   :  { %2627 = vmatprep.subr.bf16.mxu0 %v5107_v63  ;;  %2709 = vmatprep.subr.bf16.mxu1 %v5110_v0 }
 0x150   :  { %2628 = vmatpush1.bf16.msra.mxu0 %v5105_v1  ;;  %2710 = vmatpush1.bf16.msra.mxu1 %v5108_v2  ;;  %v5171_v2 = vld [vmem:[#allocation7 + $0x200] ss:$16 sps:$4 sm:$0xff]  }
 0x151   :  { %2629 = vmatprep.subr.bf16.mxu0 %v5113_v3  ;;  %2711 = vmatprep.subr.bf16.mxu1 %v5116_v4  ;;  %v5174_v3 = vld [vmem:[#allocation7 + $0x208] ss:$16 sps:$4 sm:$0xff]  }
 0x154   :  { %2630 = vmatpush1.bf16.msra.mxu0 %v5111_v5  ;;  %2712 = vmatpush1.bf16.msra.mxu1 %v5114_v6  ;;  %v5179_v5 = vld [vmem:[#allocation7 + $0x224] ss:$16 sps:$4 sm:$0xff]   ;;  %v5182_v6 = vld [vmem:[#allocation7 + $0x22c] ss:$16 sps:$4 sm:$0xff]  }
 0x155   :  { %2631 = vmatprep.subr.bf16.mxu0 %v5119_v7  ;;  %2713 = vmatprep.subr.bf16.mxu1 %v5122_v8  ;;  %v5177_v8 = vld [vmem:[#allocation7 + $0x220] ss:$16 sps:$4 sm:$0xff]  }
 0x158   :  { %2632 = vmatpush1.bf16.msra.mxu0 %v5117_v9  ;;  %2714 = vmatpush1.bf16.msra.mxu1 %v5120_v10  ;;  %v5180_v9 = vld [vmem:[#allocation7 + $0x228] ss:$16 sps:$4 sm:$0xff]   ;;  %v5185_v10 = vld [vmem:[#allocation7 + $0x244] ss:$16 sps:$4 sm:$0xff]  }
 0x159   :  { %2633 = vmatprep.subr.bf16.mxu0 %v5125_v12  ;;  %2715 = vmatprep.subr.bf16.mxu1 %v5128_v13  ;;  %v5188_v12 = vld [vmem:[#allocation7 + $0x24c] ss:$16 sps:$4 sm:$0xff]   ;;  %v5183_v13 = vld [vmem:[#allocation7 + $0x240] ss:$16 sps:$4 sm:$0xff]  }
 0x15c   :  { %2634 = vmatpush1.bf16.msra.mxu0 %v5123_v14  ;;  %2716 = vmatpush1.bf16.msra.mxu1 %v5126_v15  ;;  %v5186_v14 = vld [vmem:[#allocation7 + $0x248] ss:$16 sps:$4 sm:$0xff]   ;;  %v5191_v15 = vld [vmem:[#allocation7 + $0x264] ss:$16 sps:$4 sm:$0xff]  }
 0x15d   :  { %2635 = vmatprep.subr.bf16.mxu0 %v5131_v16  ;;  %2717 = vmatprep.subr.bf16.mxu1 %v5134_v17  ;;  %v5194_v16 = vld [vmem:[#allocation7 + $0x26c] ss:$16 sps:$4 sm:$0xff]   ;;  %v5189_v17 = vld [vmem:[#allocation7 + $0x260] ss:$16 sps:$4 sm:$0xff]  }
 0x160   :  { %2636 = vmatpush1.bf16.msra.mxu0 %v5129_v18  ;;  %2718 = vmatpush1.bf16.msra.mxu1 %v5132_v19  ;;  %v5192_v18 = vld [vmem:[#allocation7 + $0x268] ss:$16 sps:$4 sm:$0xff]   ;;  %v5197_v19 = vld [vmem:[#allocation7 + $0x284] ss:$16 sps:$4 sm:$0xff]  }
 0x161   :  { %2637 = vmatprep.subr.bf16.mxu0 %v5137_v20  ;;  %2719 = vmatprep.subr.bf16.mxu1 %v5140_v21  ;;  %v5200_v20 = vld [vmem:[#allocation7 + $0x28c] ss:$16 sps:$4 sm:$0xff]   ;;  %v5195_v21 = vld [vmem:[#allocation7 + $0x280] ss:$16 sps:$4 sm:$0xff]  }
 0x164   :  { %2638 = vmatpush1.bf16.msra.mxu0 %v5135_v22  ;;  %2720 = vmatpush1.bf16.msra.mxu1 %v5138_v11  ;;  %v5198_v22 = vld [vmem:[#allocation7 + $0x288] ss:$16 sps:$4 sm:$0xff]   ;;  %v5203_v11 = vld [vmem:[#allocation7 + $0x2a4] ss:$16 sps:$4 sm:$0xff]  }
 0x165   :  { %2639 = vmatprep.subr.bf16.mxu0 %v5143_v23  ;;  %2721 = vmatprep.subr.bf16.mxu1 %v5146_v24  ;;  %v5206_v23 = vld [vmem:[#allocation7 + $0x2ac] ss:$16 sps:$4 sm:$0xff]   ;;  %v5201_v24 = vld [vmem:[#allocation7 + $0x2a0] ss:$16 sps:$4 sm:$0xff]  }
 0x168   :  { %2640 = vmatpush1.bf16.msra.mxu0 %v5141_v25  ;;  %2722 = vmatpush1.bf16.msra.mxu1 %v5144_v26  ;;  %v5204_v25 = vld [vmem:[#allocation7 + $0x2a8] ss:$16 sps:$4 sm:$0xff]   ;;  %v5209_v26 = vld [vmem:[#allocation7 + $0x2c4] ss:$16 sps:$4 sm:$0xff]  }
 0x169   :  { %2641 = vmatprep.subr.bf16.mxu0 %v5149_v27  ;;  %2723 = vmatprep.subr.bf16.mxu1 %v5152_v28  ;;  %v5212_v27 = vld [vmem:[#allocation7 + $0x2cc] ss:$16 sps:$4 sm:$0xff]   ;;  %v5207_v28 = vld [vmem:[#allocation7 + $0x2c0] ss:$16 sps:$4 sm:$0xff]  }
 0x16c   :  { %2642 = vmatpush1.bf16.msra.mxu0 %v5147_v29  ;;  %2724 = vmatpush1.bf16.msra.mxu1 %v5150_v30  ;;  %v5210_v29 = vld [vmem:[#allocation7 + $0x2c8] ss:$16 sps:$4 sm:$0xff]   ;;  %v5215_v30 = vld [vmem:[#allocation7 + $0x2e4] ss:$16 sps:$4 sm:$0xff]  }
 0x16d   :  { %2643 = vmatprep.subr.bf16.mxu0 %v5155_v31  ;;  %2725 = vmatprep.subr.bf16.mxu1 %v5158_v32  ;;  %v5218_v31 = vld [vmem:[#allocation7 + $0x2ec] ss:$16 sps:$4 sm:$0xff]   ;;  %v5213_v32 = vld [vmem:[#allocation7 + $0x2e0] ss:$16 sps:$4 sm:$0xff]  }
 0x170   :  { %2644 = vmatpush1.bf16.msra.mxu0 %v5153_v33  ;;  %2726 = vmatpush1.bf16.msra.mxu1 %v5156_v34  ;;  %v5216_v33 = vld [vmem:[#allocation7 + $0x2e8] ss:$16 sps:$4 sm:$0xff]   ;;  %v5221_v34 = vld [vmem:[#allocation7 + $0x304] ss:$16 sps:$4 sm:$0xff]  }
 0x171   :  { %2645 = vmatprep.subr.bf16.mxu0 %v5161_v35  ;;  %2727 = vmatprep.subr.bf16.mxu1 %v5164_v36  ;;  %v5224_v35 = vld [vmem:[#allocation7 + $0x30c] ss:$16 sps:$4 sm:$0xff]   ;;  %v5219_v36 = vld [vmem:[#allocation7 + $0x300] ss:$16 sps:$4 sm:$0xff]  }
 0x174   :  { %2646 = vmatpush1.bf16.msra.mxu0 %v5159_v37  ;;  %2728 = vmatpush1.bf16.msra.mxu1 %v5162_v38  ;;  %v5222_v37 = vld [vmem:[#allocation7 + $0x308] ss:$16 sps:$4 sm:$0xff]   ;;  %v5227_v38 = vld [vmem:[#allocation7 + $0x324] ss:$16 sps:$4 sm:$0xff]  }
 0x175   :  { %2647 = vmatprep.subr.bf16.mxu0 %v5167_v39  ;;  %2729 = vmatprep.subr.bf16.mxu1 %v5170_v40  ;;  %v5230_v39 = vld [vmem:[#allocation7 + $0x32c] ss:$16 sps:$4 sm:$0xff]   ;;  %v5225_v40 = vld [vmem:[#allocation7 + $0x320] ss:$16 sps:$4 sm:$0xff]  }
 0x178   :  { %2648 = vmatpush1.bf16.msra.mxu0 %v5165_v41  ;;  %2730 = vmatpush1.bf16.msra.mxu1 %v5168_v42  ;;  %v5228_v41 = vld [vmem:[#allocation7 + $0x328] ss:$16 sps:$4 sm:$0xff]   ;;  %v5233_v42 = vld [vmem:[#allocation7 + $0x344] ss:$16 sps:$4 sm:$0xff]  }
 0x179   :  { %2658 = vmatprep.subr.bf16.mxu0 %v5173_v43  ;;  %2740 = vmatprep.subr.bf16.mxu1 %v5176_v44  ;;  %v5236_v43 = vld [vmem:[#allocation7 + $0x34c] ss:$16 sps:$4 sm:$0xff]   ;;  %v5231_v44 = vld [vmem:[#allocation7 + $0x340] ss:$16 sps:$4 sm:$0xff]  }
 0x20e   :  { %v1652_v54 = vpop.f32.mrb[0].mxu0  ;;  %v5795_v55 = vpop.f32.mrb[0].mxu1 }
 0x20f   :  { %v4669_v56 = vadd.f32 %v1652_v54, %v333_v51  ;;  %v1654_v57 = vpop.f32.mrb[1].mxu0  ;;  %v1818_v58 = vpop.f32.mrb[1].mxu1  ;;  %v5239_v51 = vld [vmem:[#allocation7 + $0x364] ss:$16 sps:$4 sm:$0xff]   ;;  %v5240_v54 = vld [vmem:[#allocation7 + $0x368] ss:$16 sps:$4 sm:$0xff]  }
 0x210   :  { %v4670_v59 = vadd.f32 %v1654_v57, %v337_v52  ;;  %v1656_v60 = vpop.f32.mrb[2].mxu0  ;;  %v1820_v61 = vpop.f32.mrb[2].mxu1  ;;  %v4672_v62 = vadd.f32 %v1818_v58, %v345_v53  ;;  %v5242_v52 = vld [vmem:[#allocation7 + $0x36c] ss:$16 sps:$4 sm:$0xff]   ;;  %v5237_v53 = vld [vmem:[#allocation7 + $0x360] ss:$16 sps:$4 sm:$0xff]  }
 0x211   :  { %v1657_v63 = vpop.f32.mrb[3].mxu0  ;;  %v1821_v0 = vpop.f32.mrb[3].mxu1  ;;  %v1823_v4 = vpack.c.bf16 %v4669_v56, %v4669_v56  ;;  %v5245_v56 = vld [vmem:[#allocation7 + $0x384] ss:$16 sps:$4 sm:$0xff]   ;;  %v5248_v57 = vld [vmem:[#allocation7 + $0x38c] ss:$16 sps:$4 sm:$0xff]  }
 0x212   :  { %v1824_v1 = vpack.c.bf16 %v4670_v59, %v4670_v59  ;;  %v1826_v7 = vpack.c.bf16 %v4672_v62, %v4672_v62  ;;  %v5243_v58 = vld [vmem:[#allocation7 + $0x380] ss:$16 sps:$4 sm:$0xff]   ;;  %v5246_v59 = vld [vmem:[#allocation7 + $0x388] ss:$16 sps:$4 sm:$0xff]   ;;  %v5251_v60 = vld [vmem:[#allocation7 + $0x3a4] ss:$16 sps:$4 sm:$0xff]  }
 0x213   :  { %v5254_v61 = vld [vmem:[#allocation7 + $0x3ac] ss:$16 sps:$4 sm:$0xff]   ;;  %v5249_v62 = vld [vmem:[#allocation7 + $0x3a0] ss:$16 sps:$4 sm:$0xff]   ;;  %v5252_v63 = vld [vmem:[#allocation7 + $0x3a8] ss:$16 sps:$4 sm:$0xff]  }
 0x214   :  { %2649 = vmatprep.mubr.bf16.mxu0 %v1824_v1  ;;  %2731 = vmatprep.mubr.bf16.mxu1 %v1824_v1  ;;  %v5798_v0 = vsub.s32 2, %v5773_v46  ;;  %v5257_v1 = vld [vmem:[#allocation7 + $0x3c4] ss:$16 sps:$4 sm:$0xff]   ;;  %v5264_v46 = vld [vmem:[#allocation7 + $0x3e8] ss:$16 sps:$4 sm:$0xff]  }
 0x215   :  { %2650 = vmatmul.mubr.bf16.vlgmr.msra.gmra.mrb[4].mxu0 %v1823_v4  ;;  %2732 = vmatmul.mubr.bf16.vlgmr.msra.gmra.mrb[4].mxu1 %v1823_v4  ;;  %v5258_v4 = vld [vmem:[#allocation7 + $0x3c8] ss:$16 sps:$4 sm:$0xff]  }
 0x216   :  { %2659 = vmatpush1.bf16.msra.mxu0 %v5171_v2  ;;  %2741 = vmatpush1.bf16.msra.mxu1 %v5174_v3  ;;  %v5260_v2 = vld [vmem:[#allocation7 + $0x3cc] ss:$16 sps:$4 sm:$0xff]   ;;  %v5255_v3 = vld [vmem:[#allocation7 + $0x3c0] ss:$16 sps:$4 sm:$0xff]  }
 0x217   :  { %2690 = vmatprep.mubr.bf16.mxu0 %v1826_v7  ;;  %2772 = vmatprep.mubr.bf16.mxu1 %v1826_v7  ;;  %v5266_v7 = vld [vmem:[#allocation7 + $0x3ec] ss:$16 sps:$4 sm:$0xff]  }
 0x218   :  { %2660 = vmatprep.subr.bf16.mxu0 %v5179_v5  ;;  %2742 = vmatprep.subr.bf16.mxu1 %v5182_v6  ;;  %v341_v5 = vrot.slane %v5781_v48, %v5798_v0  ;;  %v5263_v6 = vld [vmem:[#allocation7 + $0x3e4] ss:$16 sps:$4 sm:$0xff]  }
 0x219   :  { %v5275_v48 = vld [vmem:[#allocation8 + $0x24] ss:$16 sps:$4 sm:$0xff]  }
 0x21a   :  { %2661 = vmatpush1.bf16.msra.mxu0 %v5177_v8  ;;  %2743 = vmatpush1.bf16.msra.mxu1 %v5180_v9  ;;  %v5261_v8 = vld [vmem:[#allocation7 + $0x3e0] ss:$16 sps:$4 sm:$0xff]   ;;  %v4671_v9 = vadd.f32 %v5795_v55, %v341_v5  ;;  %v5281_v55 = vld [vmem:[#allocation8 + $0x44] ss:$16 sps:$4 sm:$0xff]   ;;  %v5350_v5 = vld [vmem:[#allocation8 + $0x1ac] ss:$16 sps:$4 sm:$0xff]  }
 0x21b   :  { %2662 = vmatprep.subr.bf16.mxu0 %v5185_v10  ;;  %2744 = vmatprep.subr.bf16.mxu1 %v5188_v12  ;;  %v5269_v10 = vld [vmem:[#allocation8 + $0x4] ss:$16 sps:$4 sm:$0xff]   ;;  %v5272_v12 = vld [vmem:[#allocation8 + $0xc] ss:$16 sps:$4 sm:$0xff]  }
 0x21e   :  { %2663 = vmatpush1.bf16.msra.mxu0 %v5183_v13  ;;  %2745 = vmatpush1.bf16.msra.mxu1 %v5186_v14  ;;  %v5267_v13 = vld [vmem:[#allocation8] ss:$16 sps:$4 sm:$0xff]   ;;  %v5270_v14 = vld [vmem:[#allocation8 + $0x8] ss:$16 sps:$4 sm:$0xff]  }
 0x21f   :  { %2664 = vmatprep.subr.bf16.mxu0 %v5191_v15  ;;  %2746 = vmatprep.subr.bf16.mxu1 %v5194_v16  ;;  %v1825_v15 = vpack.c.bf16 %v4671_v9, %v4671_v9  ;;  %v5278_v16 = vld [vmem:[#allocation8 + $0x2c] ss:$16 sps:$4 sm:$0xff]   ;;  %v5351_v9 = vld [vmem:[#allocation8 + $0x1c0] ss:$16 sps:$4 sm:$0xff]  }
 0x222   :  { %2665 = vmatpush1.bf16.msra.mxu0 %v5189_v17  ;;  %2747 = vmatpush1.bf16.msra.mxu1 %v5192_v18  ;;  %v5273_v17 = vld [vmem:[#allocation8 + $0x20] ss:$16 sps:$4 sm:$0xff]   ;;  %v5276_v18 = vld [vmem:[#allocation8 + $0x28] ss:$16 sps:$4 sm:$0xff]  }
 0x223   :  { %2666 = vmatprep.subr.bf16.mxu0 %v5197_v19  ;;  %2748 = vmatprep.subr.bf16.mxu1 %v5200_v20  ;;  %v5284_v19 = vld [vmem:[#allocation8 + $0x4c] ss:$16 sps:$4 sm:$0xff]   ;;  %v5279_v20 = vld [vmem:[#allocation8 + $0x40] ss:$16 sps:$4 sm:$0xff]  }
 0x226   :  { %2667 = vmatpush1.bf16.msra.mxu0 %v5195_v21  ;;  %2749 = vmatpush1.bf16.msra.mxu1 %v5198_v22  ;;  %v5282_v21 = vld [vmem:[#allocation8 + $0x48] ss:$16 sps:$4 sm:$0xff]   ;;  %v5287_v22 = vld [vmem:[#allocation8 + $0x64] ss:$16 sps:$4 sm:$0xff]  }
 0x227   :  { %2668 = vmatprep.subr.bf16.mxu0 %v5203_v11  ;;  %2750 = vmatprep.subr.bf16.mxu1 %v5206_v23  ;;  %v5290_v11 = vld [vmem:[#allocation8 + $0x6c] ss:$16 sps:$4 sm:$0xff]   ;;  %v5285_v23 = vld [vmem:[#allocation8 + $0x60] ss:$16 sps:$4 sm:$0xff]  }
 0x22a   :  { %2669 = vmatpush1.bf16.msra.mxu0 %v5201_v24  ;;  %2751 = vmatpush1.bf16.msra.mxu1 %v5204_v25  ;;  %v5288_v24 = vld [vmem:[#allocation8 + $0x68] ss:$16 sps:$4 sm:$0xff]   ;;  %v5293_v25 = vld [vmem:[#allocation8 + $0x84] ss:$16 sps:$4 sm:$0xff]  }
 0x22b   :  { %2670 = vmatprep.subr.bf16.mxu0 %v5209_v26  ;;  %2752 = vmatprep.subr.bf16.mxu1 %v5212_v27  ;;  %v5296_v26 = vld [vmem:[#allocation8 + $0x8c] ss:$16 sps:$4 sm:$0xff]   ;;  %v5291_v27 = vld [vmem:[#allocation8 + $0x80] ss:$16 sps:$4 sm:$0xff]  }
 0x22e   :  { %2671 = vmatpush1.bf16.msra.mxu0 %v5207_v28  ;;  %2753 = vmatpush1.bf16.msra.mxu1 %v5210_v29  ;;  %v5294_v28 = vld [vmem:[#allocation8 + $0x88] ss:$16 sps:$4 sm:$0xff]   ;;  %v5299_v29 = vld [vmem:[#allocation8 + $0xa4] ss:$16 sps:$4 sm:$0xff]  }
 0x22f   :  { %2672 = vmatprep.subr.bf16.mxu0 %v5215_v30  ;;  %2754 = vmatprep.subr.bf16.mxu1 %v5218_v31  ;;  %v5302_v30 = vld [vmem:[#allocation8 + $0xac] ss:$16 sps:$4 sm:$0xff]   ;;  %v5297_v31 = vld [vmem:[#allocation8 + $0xa0] ss:$16 sps:$4 sm:$0xff]  }
 0x232   :  { %2673 = vmatpush1.bf16.msra.mxu0 %v5213_v32  ;;  %2755 = vmatpush1.bf16.msra.mxu1 %v5216_v33  ;;  %v5300_v32 = vld [vmem:[#allocation8 + $0xa8] ss:$16 sps:$4 sm:$0xff]   ;;  %v5305_v33 = vld [vmem:[#allocation8 + $0xc4] ss:$16 sps:$4 sm:$0xff]  }
 0x233   :  { %2674 = vmatprep.subr.bf16.mxu0 %v5221_v34  ;;  %2756 = vmatprep.subr.bf16.mxu1 %v5224_v35  ;;  %v5308_v34 = vld [vmem:[#allocation8 + $0xcc] ss:$16 sps:$4 sm:$0xff]   ;;  %v5303_v35 = vld [vmem:[#allocation8 + $0xc0] ss:$16 sps:$4 sm:$0xff]  }
 0x236   :  { %2675 = vmatpush1.bf16.msra.mxu0 %v5219_v36  ;;  %2757 = vmatpush1.bf16.msra.mxu1 %v5222_v37  ;;  %v5306_v36 = vld [vmem:[#allocation8 + $0xc8] ss:$16 sps:$4 sm:$0xff]   ;;  %v5311_v37 = vld [vmem:[#allocation8 + $0xe4] ss:$16 sps:$4 sm:$0xff]  }
 0x237   :  { %2676 = vmatprep.subr.bf16.mxu0 %v5227_v38  ;;  %2758 = vmatprep.subr.bf16.mxu1 %v5230_v39  ;;  %v5314_v38 = vld [vmem:[#allocation8 + $0xec] ss:$16 sps:$4 sm:$0xff]   ;;  %v5309_v39 = vld [vmem:[#allocation8 + $0xe0] ss:$16 sps:$4 sm:$0xff]  }
 0x23a   :  { %2677 = vmatpush1.bf16.msra.mxu0 %v5225_v40  ;;  %2759 = vmatpush1.bf16.msra.mxu1 %v5228_v41  ;;  %v5312_v40 = vld [vmem:[#allocation8 + $0xe8] ss:$16 sps:$4 sm:$0xff]   ;;  %v5317_v41 = vld [vmem:[#allocation8 + $0x104] ss:$16 sps:$4 sm:$0xff]  }
 0x23b   :  { %2678 = vmatprep.subr.bf16.mxu0 %v5233_v42  ;;  %2760 = vmatprep.subr.bf16.mxu1 %v5236_v43  ;;  %v5320_v42 = vld [vmem:[#allocation8 + $0x10c] ss:$16 sps:$4 sm:$0xff]   ;;  %v5315_v43 = vld [vmem:[#allocation8 + $0x100] ss:$16 sps:$4 sm:$0xff]  }
 0x23e   :  { %2679 = vmatpush1.bf16.msra.mxu0 %v5231_v44  ;;  %2761 = vmatpush1.bf16.msra.mxu1 %v5234_v45  ;;  %v5318_v44 = vld [vmem:[#allocation8 + $0x108] ss:$16 sps:$4 sm:$0xff]   ;;  %v5323_v45 = vld [vmem:[#allocation8 + $0x124] ss:$16 sps:$4 sm:$0xff]  }
 0x23f   :  { %2680 = vmatprep.subr.bf16.mxu0 %v5239_v51  ;;  %2762 = vmatprep.subr.bf16.mxu1 %v5242_v52  ;;  %v5326_v51 = vld [vmem:[#allocation8 + $0x12c] ss:$16 sps:$4 sm:$0xff]   ;;  %v5321_v52 = vld [vmem:[#allocation8 + $0x120] ss:$16 sps:$4 sm:$0xff]  }
 0x242   :  { %2681 = vmatpush1.bf16.msra.mxu0 %v5237_v53  ;;  %2763 = vmatpush1.bf16.msra.mxu1 %v5240_v54  ;;  %v5324_v53 = vld [vmem:[#allocation8 + $0x128] ss:$16 sps:$4 sm:$0xff]   ;;  %v5329_v54 = vld [vmem:[#allocation8 + $0x144] ss:$16 sps:$4 sm:$0xff]  }
 0x243   :  { %2682 = vmatprep.subr.bf16.mxu0 %v5245_v56  ;;  %2764 = vmatprep.subr.bf16.mxu1 %v5248_v57  ;;  %v5332_v56 = vld [vmem:[#allocation8 + $0x14c] ss:$16 sps:$4 sm:$0xff]   ;;  %v5327_v57 = vld [vmem:[#allocation8 + $0x140] ss:$16 sps:$4 sm:$0xff]  }
 0x246   :  { %2683 = vmatpush1.bf16.msra.mxu0 %v5243_v58  ;;  %2765 = vmatpush1.bf16.msra.mxu1 %v5246_v59  ;;  %v5330_v58 = vld [vmem:[#allocation8 + $0x148] ss:$16 sps:$4 sm:$0xff]   ;;  %v5335_v59 = vld [vmem:[#allocation8 + $0x164] ss:$16 sps:$4 sm:$0xff]  }
 0x247   :  { %2684 = vmatprep.subr.bf16.mxu0 %v5251_v60  ;;  %2766 = vmatprep.subr.bf16.mxu1 %v5254_v61  ;;  %v5338_v60 = vld [vmem:[#allocation8 + $0x16c] ss:$16 sps:$4 sm:$0xff]   ;;  %v5333_v61 = vld [vmem:[#allocation8 + $0x160] ss:$16 sps:$4 sm:$0xff]  }
 0x24a   :  { %2685 = vmatpush1.bf16.msra.mxu0 %v5249_v62  ;;  %2767 = vmatpush1.bf16.msra.mxu1 %v5252_v63  ;;  %v5336_v62 = vld [vmem:[#allocation8 + $0x168] ss:$16 sps:$4 sm:$0xff]   ;;  %v5341_v63 = vld [vmem:[#allocation8 + $0x184] ss:$16 sps:$4 sm:$0xff]  }
 0x24b   :  { %2686 = vmatprep.subr.bf16.mxu0 %v5257_v1  ;;  %2768 = vmatprep.subr.bf16.mxu1 %v5260_v2  ;;  %v5344_v1 = vld [vmem:[#allocation8 + $0x18c] ss:$16 sps:$4 sm:$0xff]   ;;  %v5339_v2 = vld [vmem:[#allocation8 + $0x180] ss:$16 sps:$4 sm:$0xff]  }
 0x24e   :  { %2687 = vmatpush1.bf16.msra.mxu0 %v5255_v3  ;;  %2769 = vmatpush1.bf16.msra.mxu1 %v5258_v4  ;;  %v5342_v3 = vld [vmem:[#allocation8 + $0x188] ss:$16 sps:$4 sm:$0xff]   ;;  %v5347_v4 = vld [vmem:[#allocation8 + $0x1a4] ss:$16 sps:$4 sm:$0xff]  }
 0x24f   :  { %2688 = vmatprep.subr.bf16.mxu0 %v5263_v6  ;;  %2770 = vmatprep.subr.bf16.mxu1 %v5266_v7  ;;  %v5345_v6 = vld [vmem:[#allocation8 + $0x1a0] ss:$16 sps:$4 sm:$0xff]   ;;  %v5348_v7 = vld [vmem:[#allocation8 + $0x1a8] ss:$16 sps:$4 sm:$0xff]  }
 0x252   :  { %2689 = vmatpush1.bf16.msra.mxu0 %v5261_v8  ;;  %2771 = vmatpush1.bf16.msra.mxu1 %v5264_v46  ;;  %v5353_v8 = vld [vmem:[#allocation8 + $0x1c4] ss:$16 sps:$4 sm:$0xff]   ;;  %v5356_v46 = vld [vmem:[#allocation8 + $0x1cc] ss:$16 sps:$4 sm:$0xff]  }
 0x253   :  { %3575 = vmatprep.subr.bf16.mxu0 %v5269_v10  ;;  %3657 = vmatprep.subr.bf16.mxu1 %v5272_v12  ;;  %v5354_v10 = vld [vmem:[#allocation8 + $0x1c8] ss:$16 sps:$4 sm:$0xff]   ;;  %v5359_v12 = vld [vmem:[#allocation8 + $0x1e4] ss:$16 sps:$4 sm:$0xff]  }
 0x255   :  { %2691 = vmatmul.mubr.bf16.vlgmr.msra.gmra.mrb[4].mxu0 %v1825_v15  ;;  %2773 = vmatmul.mubr.bf16.vlgmr.msra.gmra.mrb[4].mxu1 %v1825_v15  ;;  %v5360_v15 = vld [vmem:[#allocation8 + $0x1e8] ss:$16 sps:$4 sm:$0xff]  }
 0x256   :  { %3576 = vmatpush1.bf16.msra.mxu0 %v5267_v13  ;;  %3658 = vmatpush1.bf16.msra.mxu1 %v5270_v14  ;;  %v5362_v13 = vld [vmem:[#allocation8 + $0x1ec] ss:$16 sps:$4 sm:$0xff]   ;;  %v5357_v14 = vld [vmem:[#allocation8 + $0x1e0] ss:$16 sps:$4 sm:$0xff]  }
 0x257   :  { %3577 = vmatprep.subr.bf16.mxu0 %v5275_v48  ;;  %3659 = vmatprep.subr.bf16.mxu1 %v5278_v16  ;;  %v5365_v48 = vld [vmem:[#allocation8 + $0x204] ss:$16 sps:$4 sm:$0xff]   ;;  %v5368_v16 = vld [vmem:[#allocation8 + $0x20c] ss:$16 sps:$4 sm:$0xff]  }
 0x25a   :  { %3578 = vmatpush1.bf16.msra.mxu0 %v5273_v17  ;;  %3660 = vmatpush1.bf16.msra.mxu1 %v5276_v18  ;;  %v5806_v17 = vld [vmem:[%s5845_s4] sm:$0xf] }
 0x25b   :  { %3579 = vmatprep.subr.bf16.mxu0 %v5281_v55  ;;  %3661 = vmatprep.subr.bf16.mxu1 %v5284_v19  ;;  %v1960_v18 = vrot.slane %v5806_v17, %v5776_v47  ;;  %v1964_v55 = vrot.slane %v5806_v17, %v5784_v49  ;;  %v1972_v19 = vrot.slane %v5806_v17, %v5787_v50 }
 0x25e   :  { %3580 = vmatpush1.bf16.msra.mxu0 %v5279_v20  ;;  %3662 = vmatpush1.bf16.msra.mxu1 %v5282_v21 }
 0x25f   :  { %3581 = vmatprep.subr.bf16.mxu0 %v5287_v22  ;;  %3663 = vmatprep.subr.bf16.mxu1 %v5290_v11 }
 0x262   :  { %3582 = vmatpush1.bf16.msra.mxu0 %v5285_v23  ;;  %3664 = vmatpush1.bf16.msra.mxu1 %v5288_v24 }
 0x263   :  { %3583 = vmatprep.subr.bf16.mxu0 %v5293_v25  ;;  %3665 = vmatprep.subr.bf16.mxu1 %v5296_v26 }
 0x266   :  { %3584 = vmatpush1.bf16.msra.mxu0 %v5291_v27  ;;  %3666 = vmatpush1.bf16.msra.mxu1 %v5294_v28 }
 0x267   :  { %3585 = vmatprep.subr.bf16.mxu0 %v5299_v29  ;;  %3667 = vmatprep.subr.bf16.mxu1 %v5302_v30 }
 0x26a   :  { %3586 = vmatpush1.bf16.msra.mxu0 %v5297_v31  ;;  %3668 = vmatpush1.bf16.msra.mxu1 %v5300_v32  ;;  %v5363_v31 = vld [vmem:[#allocation8 + $0x200] ss:$16 sps:$4 sm:$0xff]   ;;  %v5366_v32 = vld [vmem:[#allocation8 + $0x208] ss:$16 sps:$4 sm:$0xff]  }
 0x26b   :  { %3587 = vmatprep.subr.bf16.mxu0 %v5305_v33  ;;  %3669 = vmatprep.subr.bf16.mxu1 %v5308_v34  ;;  %v5371_v34 = vld [vmem:[#allocation8 + $0x224] ss:$16 sps:$4 sm:$0xff]  }
 0x26e   :  { %3588 = vmatpush1.bf16.msra.mxu0 %v5303_v35  ;;  %3670 = vmatpush1.bf16.msra.mxu1 %v5306_v36  ;;  %v5374_v35 = vld [vmem:[#allocation8 + $0x22c] ss:$16 sps:$4 sm:$0xff]  }
 0x26f   :  { %3589 = vmatprep.subr.bf16.mxu0 %v5311_v37  ;;  %3671 = vmatprep.subr.bf16.mxu1 %v5314_v38  ;;  %v5369_v37 = vld [vmem:[#allocation8 + $0x220] ss:$16 sps:$4 sm:$0xff]   ;;  %v5372_v38 = vld [vmem:[#allocation8 + $0x228] ss:$16 sps:$4 sm:$0xff]  }
 0x272   :  { %3590 = vmatpush1.bf16.msra.mxu0 %v5309_v39  ;;  %3672 = vmatpush1.bf16.msra.mxu1 %v5312_v40  ;;  %v5377_v39 = vld [vmem:[#allocation8 + $0x244] ss:$16 sps:$4 sm:$0xff]   ;;  %v5380_v40 = vld [vmem:[#allocation8 + $0x24c] ss:$16 sps:$4 sm:$0xff]  }
 0x273   :  { %3591 = vmatprep.subr.bf16.mxu0 %v5317_v41  ;;  %3673 = vmatprep.subr.bf16.mxu1 %v5320_v42  ;;  %v5375_v41 = vld [vmem:[#allocation8 + $0x240] ss:$16 sps:$4 sm:$0xff]   ;;  %v5378_v42 = vld [vmem:[#allocation8 + $0x248] ss:$16 sps:$4 sm:$0xff]  }
 0x276   :  { %3592 = vmatpush1.bf16.msra.mxu0 %v5315_v43  ;;  %3674 = vmatpush1.bf16.msra.mxu1 %v5318_v44  ;;  %v5383_v43 = vld [vmem:[#allocation8 + $0x264] ss:$16 sps:$4 sm:$0xff]   ;;  %v5386_v44 = vld [vmem:[#allocation8 + $0x26c] ss:$16 sps:$4 sm:$0xff]  }
 0x277   :  { %3593 = vmatprep.subr.bf16.mxu0 %v5323_v45  ;;  %3675 = vmatprep.subr.bf16.mxu1 %v5326_v51  ;;  %v5381_v45 = vld [vmem:[#allocation8 + $0x260] ss:$16 sps:$4 sm:$0xff]   ;;  %v5384_v51 = vld [vmem:[#allocation8 + $0x268] ss:$16 sps:$4 sm:$0xff]  }
 0x27a   :  { %3594 = vmatpush1.bf16.msra.mxu0 %v5321_v52  ;;  %3676 = vmatpush1.bf16.msra.mxu1 %v5324_v53  ;;  %v5389_v52 = vld [vmem:[#allocation8 + $0x284] ss:$16 sps:$4 sm:$0xff]   ;;  %v5392_v53 = vld [vmem:[#allocation8 + $0x28c] ss:$16 sps:$4 sm:$0xff]  }
 0x27b   :  { %3595 = vmatprep.subr.bf16.mxu0 %v5329_v54  ;;  %3677 = vmatprep.subr.bf16.mxu1 %v5332_v56  ;;  %v5387_v54 = vld [vmem:[#allocation8 + $0x280] ss:$16 sps:$4 sm:$0xff]   ;;  %v5390_v56 = vld [vmem:[#allocation8 + $0x288] ss:$16 sps:$4 sm:$0xff]  }
 0x27e   :  { %3596 = vmatpush1.bf16.msra.mxu0 %v5327_v57  ;;  %3678 = vmatpush1.bf16.msra.mxu1 %v5330_v58  ;;  %v5395_v57 = vld [vmem:[#allocation8 + $0x2a4] ss:$16 sps:$4 sm:$0xff]   ;;  %v5398_v58 = vld [vmem:[#allocation8 + $0x2ac] ss:$16 sps:$4 sm:$0xff]  }
 0x27f   :  { %3597 = vmatprep.subr.bf16.mxu0 %v5335_v59  ;;  %3679 = vmatprep.subr.bf16.mxu1 %v5338_v60  ;;  %v5393_v59 = vld [vmem:[#allocation8 + $0x2a0] ss:$16 sps:$4 sm:$0xff]   ;;  %v5396_v60 = vld [vmem:[#allocation8 + $0x2a8] ss:$16 sps:$4 sm:$0xff]  }
 0x282   :  { %3598 = vmatpush1.bf16.msra.mxu0 %v5333_v61  ;;  %3680 = vmatpush1.bf16.msra.mxu1 %v5336_v62  ;;  %v5401_v61 = vld [vmem:[#allocation8 + $0x2c4] ss:$16 sps:$4 sm:$0xff]   ;;  %v5404_v62 = vld [vmem:[#allocation8 + $0x2cc] ss:$16 sps:$4 sm:$0xff]  }
 0x283   :  { %3599 = vmatprep.subr.bf16.mxu0 %v5341_v63  ;;  %3681 = vmatprep.subr.bf16.mxu1 %v5344_v1  ;;  %v5399_v63 = vld [vmem:[#allocation8 + $0x2c0] ss:$16 sps:$4 sm:$0xff]   ;;  %v5402_v1 = vld [vmem:[#allocation8 + $0x2c8] ss:$16 sps:$4 sm:$0xff]  }
 0x286   :  { %3600 = vmatpush1.bf16.msra.mxu0 %v5339_v2  ;;  %3682 = vmatpush1.bf16.msra.mxu1 %v5342_v3  ;;  %v5407_v2 = vld [vmem:[#allocation8 + $0x2e4] ss:$16 sps:$4 sm:$0xff]   ;;  %v5410_v3 = vld [vmem:[#allocation8 + $0x2ec] ss:$16 sps:$4 sm:$0xff]  }
 0x287   :  { %3601 = vmatprep.subr.bf16.mxu0 %v5347_v4  ;;  %3683 = vmatprep.subr.bf16.mxu1 %v5350_v5  ;;  %v5405_v4 = vld [vmem:[#allocation8 + $0x2e0] ss:$16 sps:$4 sm:$0xff]   ;;  %v5408_v5 = vld [vmem:[#allocation8 + $0x2e8] ss:$16 sps:$4 sm:$0xff]  }
 0x28a   :  { %3602 = vmatpush1.bf16.msra.mxu0 %v5345_v6  ;;  %3684 = vmatpush1.bf16.msra.mxu1 %v5348_v7  ;;  %v5413_v6 = vld [vmem:[#allocation8 + $0x304] ss:$16 sps:$4 sm:$0xff]   ;;  %v5416_v7 = vld [vmem:[#allocation8 + $0x30c] ss:$16 sps:$4 sm:$0xff]  }
 0x28b   :  { %3603 = vmatprep.subr.bf16.mxu0 %v5353_v8  ;;  %3685 = vmatprep.subr.bf16.mxu1 %v5356_v46  ;;  %v5411_v8 = vld [vmem:[#allocation8 + $0x300] ss:$16 sps:$4 sm:$0xff]   ;;  %v5414_v46 = vld [vmem:[#allocation8 + $0x308] ss:$16 sps:$4 sm:$0xff]  }
 0x28e   :  { %3604 = vmatpush1.bf16.msra.mxu0 %v5351_v9  ;;  %3686 = vmatpush1.bf16.msra.mxu1 %v5354_v10  ;;  %v5419_v9 = vld [vmem:[#allocation8 + $0x324] ss:$16 sps:$4 sm:$0xff]   ;;  %v5422_v10 = vld [vmem:[#allocation8 + $0x32c] ss:$16 sps:$4 sm:$0xff]  }
 0x28f   :  { %3605 = vmatprep.subr.bf16.mxu0 %v5359_v12  ;;  %3687 = vmatprep.subr.bf16.mxu1 %v5362_v13  ;;  %v5417_v12 = vld [vmem:[#allocation8 + $0x320] ss:$16 sps:$4 sm:$0xff]   ;;  %v5420_v13 = vld [vmem:[#allocation8 + $0x328] ss:$16 sps:$4 sm:$0xff]  }
 0x292   :  { %3606 = vmatpush1.bf16.msra.mxu0 %v5357_v14  ;;  %3688 = vmatpush1.bf16.msra.mxu1 %v5360_v15  ;;  %v5425_v14 = vld [vmem:[#allocation8 + $0x344] ss:$16 sps:$4 sm:$0xff]   ;;  %v5428_v15 = vld [vmem:[#allocation8 + $0x34c] ss:$16 sps:$4 sm:$0xff]  }
 0x293   :  { %3616 = vmatprep.subr.bf16.mxu0 %v5365_v48  ;;  %3698 = vmatprep.subr.bf16.mxu1 %v5368_v16  ;;  %v5423_v48 = vld [vmem:[#allocation8 + $0x340] ss:$16 sps:$4 sm:$0xff]   ;;  %v5426_v16 = vld [vmem:[#allocation8 + $0x348] ss:$16 sps:$4 sm:$0xff]  }
 0x328   :  { %v2692_v20 = vpop.f32.mrb[4].mxu0  ;;  %v5814_v21 = vpop.f32.mrb[4].mxu1 }
 0x329   :  { %v4673_v22 = vadd.f32 %v2692_v20, %v1960_v18  ;;  %v2694_v11 = vpop.f32.mrb[5].mxu0  ;;  %v2776_v23 = vpop.f32.mrb[5].mxu1  ;;  %v5431_v18 = vld [vmem:[#allocation8 + $0x364] ss:$16 sps:$4 sm:$0xff]   ;;  %v5432_v20 = vld [vmem:[#allocation8 + $0x368] ss:$16 sps:$4 sm:$0xff]  }
 0x32a   :  { %v4674_v24 = vadd.f32 %v2694_v11, %v1964_v55  ;;  %v2696_v25 = vpop.f32.mrb[6].mxu0  ;;  %v2778_v26 = vpop.f32.mrb[6].mxu1  ;;  %v4676_v27 = vadd.f32 %v2776_v23, %v1972_v19  ;;  %v5434_v55 = vld [vmem:[#allocation8 + $0x36c] ss:$16 sps:$4 sm:$0xff]   ;;  %v5429_v19 = vld [vmem:[#allocation8 + $0x360] ss:$16 sps:$4 sm:$0xff]  }
 0x32b   :  { %v2697_v28 = vpop.f32.mrb[7].mxu0  ;;  %v2779_v29 = vpop.f32.mrb[7].mxu1  ;;  %v2781_v33 = vpack.c.bf16 %v4673_v22, %v4673_v22  ;;  %v5437_v22 = vld [vmem:[#allocation8 + $0x384] ss:$16 sps:$4 sm:$0xff]   ;;  %v5440_v11 = vld [vmem:[#allocation8 + $0x38c] ss:$16 sps:$4 sm:$0xff]  }
 0x32c   :  { %v2782_v30 = vpack.c.bf16 %v4674_v24, %v4674_v24  ;;  %v2784_v36 = vpack.c.bf16 %v4676_v27, %v4676_v27  ;;  %v5435_v23 = vld [vmem:[#allocation8 + $0x380] ss:$16 sps:$4 sm:$0xff]   ;;  %v5438_v24 = vld [vmem:[#allocation8 + $0x388] ss:$16 sps:$4 sm:$0xff]   ;;  %v5443_v25 = vld [vmem:[#allocation8 + $0x3a4] ss:$16 sps:$4 sm:$0xff]  }
 0x32d   :  { %v5446_v26 = vld [vmem:[#allocation8 + $0x3ac] ss:$16 sps:$4 sm:$0xff]   ;;  %v5441_v27 = vld [vmem:[#allocation8 + $0x3a0] ss:$16 sps:$4 sm:$0xff]   ;;  %v5444_v28 = vld [vmem:[#allocation8 + $0x3a8] ss:$16 sps:$4 sm:$0xff]  }
 0x32e   :  { %3607 = vmatprep.mubr.bf16.mxu0 %v2782_v30  ;;  %3689 = vmatprep.mubr.bf16.mxu1 %v2782_v30  ;;  %v5449_v29 = vld [vmem:[#allocation8 + $0x3c4] ss:$16 sps:$4 sm:$0xff]   ;;  %v5452_v30 = vld [vmem:[#allocation8 + $0x3cc] ss:$16 sps:$4 sm:$0xff]  }
 0x32f   :  { %3608 = vmatmul.mubr.bf16.vlgmr.msra.gmra.mrb[8].mxu0 %v2781_v33  ;;  %3690 = vmatmul.mubr.bf16.vlgmr.msra.gmra.mrb[8].mxu1 %v2781_v33  ;;  %v1968_v33 = vrot.slane %v5806_v17, %v5798_v0  ;;  %v5463_v17 = vld [vmem:[#allocation10 + $0x48] sm:$0xff]  }
 0x330   :  { %3617 = vmatpush1.bf16.msra.mxu0 %v5363_v31  ;;  %3699 = vmatpush1.bf16.msra.mxu1 %v5366_v32  ;;  %v5447_v31 = vld [vmem:[#allocation8 + $0x3c0] ss:$16 sps:$4 sm:$0xff]   ;;  %v5450_v32 = vld [vmem:[#allocation8 + $0x3c8] ss:$16 sps:$4 sm:$0xff]  }
 0x331   :  { %3648 = vmatprep.mubr.bf16.mxu0 %v2784_v36  ;;  %3730 = vmatprep.mubr.bf16.mxu1 %v2784_v36  ;;  %v5453_v36 = vld [vmem:[#allocation8 + $0x3e0] ss:$16 sps:$4 sm:$0xff]  }
 0x332   :  { %3618 = vmatprep.subr.bf16.mxu0 %v5371_v34  ;;  %3700 = vmatprep.subr.bf16.mxu1 %v5374_v35  ;;  %v5455_v34 = vld [vmem:[#allocation8 + $0x3e4] ss:$16 sps:$4 sm:$0xff]   ;;  %v5458_v35 = vld [vmem:[#allocation8 + $0x3ec] ss:$16 sps:$4 sm:$0xff]  }
 0x334   :  { %3619 = vmatpush1.bf16.msra.mxu0 %v5369_v37  ;;  %3701 = vmatpush1.bf16.msra.mxu1 %v5372_v38  ;;  %v5456_v37 = vld [vmem:[#allocation8 + $0x3e8] ss:$16 sps:$4 sm:$0xff]   ;;  %v4675_v38 = vadd.f32 %v5814_v21, %v1968_v33  ;;  %v5467_v21 = vld [vmem:[#allocation10 + $0x50] sm:$0xff]  }
 0x335   :  { %3620 = vmatprep.subr.bf16.mxu0 %v5377_v39  ;;  %3702 = vmatprep.subr.bf16.mxu1 %v5380_v40  ;;  %v5459_v39 = vld [vmem:[#allocation10 + $0x40] sm:$0xff]  }
 0x336   :  { %v5460_v40 = vld [vmem:[#allocation10 + $0xc0] sm:$0xff]  }
 0x338   :  { %3621 = vmatpush1.bf16.msra.mxu0 %v5375_v41  ;;  %3703 = vmatpush1.bf16.msra.mxu1 %v5378_v42  ;;  %v5461_v41 = vld [vmem:[#allocation10] sm:$0xff]  }
 0x339   :  { %3622 = vmatprep.subr.bf16.mxu0 %v5383_v43  ;;  %3704 = vmatprep.subr.bf16.mxu1 %v5386_v44  ;;  %v5462_v42 = vld [vmem:[#allocation10 + $0x80] sm:$0xff]   ;;  %v2783_v43 = vpack.c.bf16 %v4675_v38, %v4675_v38  ;;  %v5464_v44 = vld [vmem:[#allocation10 + $0xc8] sm:$0xff]  }
 0x33c   :  { %3623 = vmatpush1.bf16.msra.mxu0 %v5381_v45  ;;  %3705 = vmatpush1.bf16.msra.mxu1 %v5384_v51  ;;  %v5465_v45 = vld [vmem:[#allocation10 + $0x8] sm:$0xff]  }
 0x33d   :  { %3624 = vmatprep.subr.bf16.mxu0 %v5389_v52  ;;  %3706 = vmatprep.subr.bf16.mxu1 %v5392_v53  ;;  %v5466_v51 = vld [vmem:[#allocation10 + $0x88] sm:$0xff]   ;;  %v5468_v52 = vld [vmem:[#allocation10 + $0xd0] sm:$0xff]  }
 0x33e   :  { %v5469_v53 = vld [vmem:[#allocation10 + $0x10] sm:$0xff]  }
 0x340   :  { %3625 = vmatpush1.bf16.msra.mxu0 %v5387_v54  ;;  %3707 = vmatpush1.bf16.msra.mxu1 %v5390_v56  ;;  %v5470_v54 = vld [vmem:[#allocation10 + $0x90] sm:$0xff]   ;;  %v5471_v56 = vld [vmem:[#allocation10 + $0x58] sm:$0xff]  }
 0x341   :  { %3626 = vmatprep.subr.bf16.mxu0 %v5395_v57  ;;  %3708 = vmatprep.subr.bf16.mxu1 %v5398_v58  ;;  %v5472_v57 = vld [vmem:[#allocation10 + $0xd8] sm:$0xff]  }
 0x342   :  { %v5473_v58 = vld [vmem:[#allocation10 + $0x18] sm:$0xff]  }
 0x344   :  { %3627 = vmatpush1.bf16.msra.mxu0 %v5393_v59  ;;  %3709 = vmatpush1.bf16.msra.mxu1 %v5396_v60  ;;  %v5474_v59 = vld [vmem:[#allocation10 + $0x98] sm:$0xff]   ;;  %v5475_v60 = vld [vmem:[#allocation10 + $0x60] sm:$0xff]  }
 0x345   :  { %3628 = vmatprep.subr.bf16.mxu0 %v5401_v61  ;;  %3710 = vmatprep.subr.bf16.mxu1 %v5404_v62  ;;  %v5476_v61 = vld [vmem:[#allocation10 + $0xe0] sm:$0xff]  }
 0x346   :  { %v5477_v62 = vld [vmem:[#allocation10 + $0x20] sm:$0xff]  }
 0x348   :  { %3629 = vmatpush1.bf16.msra.mxu0 %v5399_v63  ;;  %3711 = vmatpush1.bf16.msra.mxu1 %v5402_v1  ;;  %v5478_v63 = vld [vmem:[#allocation10 + $0xa0] sm:$0xff]   ;;  %v5479_v1 = vld [vmem:[#allocation10 + $0x68] sm:$0xff]  }
 0x349   :  { %3630 = vmatprep.subr.bf16.mxu0 %v5407_v2  ;;  %3712 = vmatprep.subr.bf16.mxu1 %v5410_v3  ;;  %v5480_v2 = vld [vmem:[#allocation10 + $0xe8] sm:$0xff]  }
 0x34a   :  { %v5481_v3 = vld [vmem:[#allocation10 + $0x28] sm:$0xff]  }
 0x34c   :  { %3631 = vmatpush1.bf16.msra.mxu0 %v5405_v4  ;;  %3713 = vmatpush1.bf16.msra.mxu1 %v5408_v5  ;;  %v5482_v4 = vld [vmem:[#allocation10 + $0xa8] sm:$0xff]   ;;  %v5483_v5 = vld [vmem:[#allocation10 + $0x70] sm:$0xff]  }
 0x34d   :  { %3632 = vmatprep.subr.bf16.mxu0 %v5413_v6  ;;  %3714 = vmatprep.subr.bf16.mxu1 %v5416_v7  ;;  %v5484_v6 = vld [vmem:[#allocation10 + $0xf0] sm:$0xff]  }
 0x34e   :  { %v5485_v7 = vld [vmem:[#allocation10 + $0x30] sm:$0xff]  }
 0x350   :  { %3633 = vmatpush1.bf16.msra.mxu0 %v5411_v8  ;;  %3715 = vmatpush1.bf16.msra.mxu1 %v5414_v46  ;;  %v5486_v8 = vld [vmem:[#allocation10 + $0xb0] sm:$0xff]   ;;  %v5487_v46 = vld [vmem:[#allocation10 + $0x78] sm:$0xff]  }
 0x351   :  { %3634 = vmatprep.subr.bf16.mxu0 %v5419_v9  ;;  %3716 = vmatprep.subr.bf16.mxu1 %v5422_v10  ;;  %v5488_v9 = vld [vmem:[#allocation10 + $0xf8] sm:$0xff]  }
 0x352   :  { %v5489_v10 = vld [vmem:[#allocation10 + $0x38] sm:$0xff]  }
 0x354   :  { %3635 = vmatpush1.bf16.msra.mxu0 %v5417_v12  ;;  %3717 = vmatpush1.bf16.msra.mxu1 %v5420_v13  ;;  %v5490_v12 = vld [vmem:[#allocation10 + $0xb8] sm:$0xff]   ;;  %v2913_v13 = vld [vmem:[%s5847_s6] sm:$0xf] }
 0x355   :  { %3636 = vmatprep.subr.bf16.mxu0 %v5425_v14  ;;  %3718 = vmatprep.subr.bf16.mxu1 %v5428_v15  ;;  %v2918_v14 = vrot.slane %v2913_v13, %v5776_v47  ;;  %v2926_v15 = vrot.slane %v2913_v13, %v5798_v0 }
 0x358   :  { %3637 = vmatpush1.bf16.msra.mxu0 %v5423_v48  ;;  %3719 = vmatpush1.bf16.msra.mxu1 %v5426_v16  ;;  %v2922_v48 = vrot.slane %v2913_v13, %v5784_v49  ;;  %v2930_v16 = vrot.slane %v2913_v13, %v5787_v50 }
 0x359   :  { %3638 = vmatprep.subr.bf16.mxu0 %v5431_v18  ;;  %3720 = vmatprep.subr.bf16.mxu1 %v5434_v55 }
 0x35c   :  { %3639 = vmatpush1.bf16.msra.mxu0 %v5429_v19  ;;  %3721 = vmatpush1.bf16.msra.mxu1 %v5432_v20 }
 0x35d   :  { %3640 = vmatprep.subr.bf16.mxu0 %v5437_v22  ;;  %3722 = vmatprep.subr.bf16.mxu1 %v5440_v11 }
 0x360   :  { %3641 = vmatpush1.bf16.msra.mxu0 %v5435_v23  ;;  %3723 = vmatpush1.bf16.msra.mxu1 %v5438_v24 }
 0x361   :  { %3642 = vmatprep.subr.bf16.mxu0 %v5443_v25  ;;  %3724 = vmatprep.subr.bf16.mxu1 %v5446_v26 }
 0x364   :  { %3643 = vmatpush1.bf16.msra.mxu0 %v5441_v27  ;;  %3725 = vmatpush1.bf16.msra.mxu1 %v5444_v28 }
 0x365   :  { %3644 = vmatprep.subr.bf16.mxu0 %v5449_v29  ;;  %3726 = vmatprep.subr.bf16.mxu1 %v5452_v30 }
 0x368   :  { %3645 = vmatpush1.bf16.msra.mxu0 %v5447_v31  ;;  %3727 = vmatpush1.bf16.msra.mxu1 %v5450_v32  ;;  %v4592_v31 = vld [vmem:[%s5849_s8] ss:$0 sm:$0xff] }
 0x369   :  { %3646 = vmatprep.subr.bf16.mxu0 %v5455_v34  ;;  %3728 = vmatprep.subr.bf16.mxu1 %v5458_v35 }
 0x36c   :  { %3647 = vmatpush1.bf16.msra.mxu0 %v5453_v36  ;;  %3729 = vmatpush1.bf16.msra.mxu1 %v5456_v37 }
 0x36d   :  { %4625 = vmatprep.subr.bf16.mxu0 %v5459_v39  ;;  %4647 = vmatprep.subr.bf16.mxu1 %v5460_v40 }
 0x36f   :  { %3649 = vmatmul.mubr.bf16.vlgmr.msra.gmra.mrb[8].mxu0 %v2783_v43  ;;  %3731 = vmatmul.mubr.bf16.vlgmr.msra.gmra.mrb[8].mxu1 %v2783_v43 }
 0x370   :  { %4626 = vmatpush3.bf16.msra.mxu0 %v5461_v41  ;;  %4648 = vmatpush3.bf16.msra.mxu1 %v5462_v42 }
 0x371   :  { %4627 = vmatprep.subr.bf16.mxu0 %v5463_v17  ;;  %4649 = vmatprep.subr.bf16.mxu1 %v5464_v44 }
 0x374   :  { %4628 = vmatpush3.bf16.msra.mxu0 %v5465_v45  ;;  %4650 = vmatpush3.bf16.msra.mxu1 %v5466_v51 }
 0x375   :  { %4629 = vmatprep.subr.bf16.mxu0 %v5467_v21  ;;  %4651 = vmatprep.subr.bf16.mxu1 %v5468_v52 }
 0x378   :  { %4630 = vmatpush3.bf16.msra.mxu0 %v5469_v53  ;;  %4652 = vmatpush3.bf16.msra.mxu1 %v5470_v54 }
 0x379   :  { %4631 = vmatprep.subr.bf16.mxu0 %v5471_v56  ;;  %4653 = vmatprep.subr.bf16.mxu1 %v5472_v57 }
 0x37c   :  { %4632 = vmatpush3.bf16.msra.mxu0 %v5473_v58  ;;  %4654 = vmatpush3.bf16.msra.mxu1 %v5474_v59 }
 0x37d   :  { %4633 = vmatprep.subr.bf16.mxu0 %v5475_v60  ;;  %4655 = vmatprep.subr.bf16.mxu1 %v5476_v61 }
 0x380   :  { %4634 = vmatpush3.bf16.msra.mxu0 %v5477_v62  ;;  %4656 = vmatpush3.bf16.msra.mxu1 %v5478_v63 }
 0x381   :  { %4635 = vmatprep.subr.bf16.mxu0 %v5479_v1  ;;  %4657 = vmatprep.subr.bf16.mxu1 %v5480_v2 }
 0x384   :  { %4636 = vmatpush3.bf16.msra.mxu0 %v5481_v3  ;;  %4658 = vmatpush3.bf16.msra.mxu1 %v5482_v4 }
 0x385   :  { %4637 = vmatprep.subr.bf16.mxu0 %v5483_v5  ;;  %4659 = vmatprep.subr.bf16.mxu1 %v5484_v6 }
 0x388   :  { %4638 = vmatpush3.bf16.msra.mxu0 %v5485_v7  ;;  %4660 = vmatpush3.bf16.msra.mxu1 %v5486_v8 }
 0x389   :  { %4639 = vmatprep.subr.bf16.mxu0 %v5487_v46  ;;  %4661 = vmatprep.subr.bf16.mxu1 %v5488_v9 }
 0x38c   :  { %4640 = vmatpush3.bf16.msra.mxu0 %v5489_v10  ;;  %4662 = vmatpush3.bf16.msra.mxu1 %v5490_v12 }
 0x442   :  { %v3650_v18 = vpop.f32.mrb[8].mxu0  ;;  %v3732_v55 = vpop.f32.mrb[8].mxu1 }
 0x443   :  { %v4677_v19 = vadd.f32 %v3650_v18, %v2918_v14  ;;  %v4679_v20 = vadd.f32 %v3732_v55, %v2926_v15  ;;  %v3652_v22 = vpop.f32.mrb[9].mxu0  ;;  %v3734_v11 = vpop.f32.mrb[9].mxu1 }
 0x444   :  { %v4678_v23 = vadd.f32 %v3652_v22, %v2922_v48  ;;  %v4680_v24 = vadd.f32 %v3734_v11, %v2930_v16  ;;  %v3654_v25 = vpop.f32.mrb[10].mxu0  ;;  %v3736_v26 = vpop.f32.mrb[10].mxu1 }
 0x445   :  { %v3655_v27 = vpop.f32.mrb[11].mxu0  ;;  %v3737_v28 = vpop.f32.mrb[11].mxu1  ;;  %v3739_v30 = vpack.c.bf16 %v4677_v19, %v4677_v19  ;;  %v3741_v0 = vpack.c.bf16 %v4679_v20, %v4679_v20 }
 0x446   :  { %v3740_v29 = vpack.c.bf16 %v4678_v23, %v4678_v23  ;;  %v3742_v47 = vpack.c.bf16 %v4680_v24, %v4680_v24 }
 0x448   :  { %4038 = vmatprep.mubr.bf16.mxu0 %v3740_v29  ;;  %4078 = vmatprep.mubr.bf16.mxu1 %v3742_v47 }
 0x449   :  { %4039 = vmatmul.mubr.bf16.vlgmr.msra.gmra.mrb[12].mxu0 %v3739_v30  ;;  %4079 = vmatmul.mubr.bf16.vlgmr.msra.gmra.mrb[12].mxu1 %v3741_v0 }
 0x51c   :  { %v4641_v49 = vpop.f32.mrb[12].mxu0  ;;  %v4663_v50 = vpop.f32.mrb[12].mxu1 }
 0x51d   :  { %v4642_v32 = vpop.f32.mrb[13].mxu0  ;;  %v4664_v33 = vpop.f32.mrb[13].mxu1 }
 0x51e   :  { %v4643_v34 = vadd.f32 %v4642_v32, %v4641_v49  ;;  %v4665_v35 = vadd.f32 %v4664_v33, %v4663_v50  ;;  %v4644_v36 = vpop.f32.mrb[14].mxu0  ;;  %v4666_v37 = vpop.f32.mrb[14].mxu1 }
 0x51f   :  { %v4645_v38 = vpop.f32.mrb[15].mxu0  ;;  %v4667_v39 = vpop.f32.mrb[15].mxu1 }
 0x520   :  { %v4041_v40 = vadd.f32 %v4643_v34, %v4592_v31 }
 0x522   :  { %v4081_v41 = vadd.f32 %v4665_v35, %v4041_v40 }
 0x524   :  { %v4086_v42 = vpack.c.bf16 %v4081_v41, %v4081_v41 }
 0x526   :  { %4087 = vst [vmem:[#allocation11] sm:$0xf] %v4086_v42 }
 0x527   :  { %5612 = shalt.err (!%p5609_p2)
}
 0x528   :  { %s5613_s14 = scalar_lea.hbm %s5850_s9, 64 }
 0x529   :  { %p5614_p3 = scmp.ne.s32.totalorder %s5850_s9, %s5613_s14  ;;  %p5617_p4 = scmp.lt.u32.totalorder %s5613_s14, %s5850_s9 }
 0x52b   :  { %p5619_p5 = pnand %p5617_p4, %p5614_p3 }
 0x52d   :  { %5622 = shalt.err (!%p5619_p5)
}
 0x52e   :  { %4097 = dma.vmem_to_hbm [thread:$0]  %s4095_s13, 64, %s5850_s9, [#allocation4]  }
 0x52f   :  { %5629 = dma.done.wait [#allocation4], 64  }
 0x530   :  { %5630 = vsyncadd [#allocation4], 4294967232 }
 0x531   :  { %4101 = vsyncpa [#allocation3], 1 }
 0x532   :  { %4102 = vsyncpa [#allocation6], 1 }
 0x533   :  { %4103 = vsyncpa [#allocation9], 1 }
 0x534   :  { %4104 = vsyncpa [#allocation4], 1 }

</bundles_post_ra>
